<compile_context>
chip_gen: v7x
topology: tpu7x:2x2x1
jax: 0.10.0
libtpu: 0.0.40
codegen_flags: <defaults>
</compile_context>

<pallas_src>
import jax
import jax.numpy as jnp
from jax.experimental import pallas as pl
from jax.experimental.pallas import tpu as pltpu


def _choose_row_tile(n, cap):
    """Pick (rows_per_step, padded_row_count) for the gather grid."""
    cap = max(8, cap - cap % 8)            # keep the tile sublane-aligned
    if n <= cap:
        return n, n                        # one step covers the full row axis
    # Prefer a sublane-aligned divisor of n: no padding, no output slice copy.
    for cand in range(cap, 7, -8):
        if n % cand == 0:
            return cand, n
    # Otherwise pad the row axis up to a multiple of a full tile.
    n_pad = ((n + cap - 1) // cap) * cap
    return cap, n_pad


def value_embedding_forward(inputs, tables, *, max_rows_per_step=128):
    """Pallas implementation of ValueEmbedding.forward.

    inputs: (B, S) int32 token ids
    tables: (3, V, D) stacked embedding weights
    returns: [e0, e1, e2, None*6, e0, e1, e2], each e_i of shape (B, S, D).
    """
    B, S = inputs.shape
    num_tables, V, D = tables.shape
    N = B * S

    TN, N_pad = _choose_row_tile(N, max_rows_per_step)

    # Ids go to SMEM via scalar prefetch.  Clamp keeps every DMA in bounds;
    # padded rows gather row 0 and are sliced away afterwards.
    ids_flat = jnp.clip(inputs.reshape(N).astype(jnp.int32), 0, V - 1)
    if N_pad > N:
        ids_flat = jnp.concatenate(
            [ids_flat, jnp.zeros((N_pad - N,), jnp.int32)])

    # Flatten the stacked tables so each gather is a single dynamic row index.
    table_flat = tables.reshape(num_tables * V, D)

    def kernel(ids_ref, table_ref, out_ref, sem):
        # ids_ref:   (N_pad,) int32 in SMEM (scalar-prefetched token ids)
        # table_ref: (num_tables*V, D) in HBM (memory_space=pl.ANY)
        # out_ref:   (1, TN, D) VMEM output tile for (table e, row-tile i)
        # sem:       (1,) shared DMA completion semaphore
        e = pl.program_id(0)
        i = pl.program_id(1)
        base = i * TN
        # Issue all TN row gathers (HBM table row -> VMEM output row); they
        # stay in flight together on one semaphore, then drain.
        copies = []
        for r in range(TN):
            row = e * V + ids_ref[base + r]
            cp = pltpu.make_async_copy(
                table_ref.at[pl.ds(row, 1), :],
                out_ref.at[0, pl.ds(r, 1), :],
                sem.at[0])
            cp.start()
            copies.append(cp)
        for cp in copies:
            cp.wait()

    itemsize = jnp.dtype(tables.dtype).itemsize
    # gather reads + output writeback + ids read
    bytes_moved = num_tables * N_pad * D * itemsize * 2 + N_pad * 4

    out = pl.pallas_call(
        kernel,
        out_shape=jax.ShapeDtypeStruct((num_tables, N_pad, D), tables.dtype),
        grid_spec=pltpu.PrefetchScalarGridSpec(
            num_scalar_prefetch=1,
            grid=(num_tables, N_pad // TN),
            in_specs=[pl.BlockSpec(memory_space=pl.ANY)],   # tables stay in HBM
            out_specs=pl.BlockSpec((1, TN, D), lambda e, i, ids: (e, i, 0)),
            scratch_shapes=[pltpu.SemaphoreType.DMA((1,))],
        ),
        compiler_params=pltpu.CompilerParams(
            dimension_semantics=("parallel", "parallel"),
            vmem_limit_bytes=32 * 1024 * 1024,
        ),
        cost_estimate=pl.CostEstimate(
            flops=0, transcendentals=0, bytes_accessed=bytes_moved),
    )(ids_flat, table_flat)

    if N_pad > N:
        out = out[:, :N]

    ve = [out[i].reshape(B, S, D) for i in range(num_tables)]
    return [ve[0], ve[1], ve[2], None, None, None, None, None, None,
            ve[0], ve[1], ve[2]]


if __name__ == "__main__":
    # Small, module-consistent shapes (lane-dense D for clean vst layout).
    B, S = 2, 8          # batch, sequence
    V, D = 64, 128       # num_embeddings, embedding_dim

    key = jax.random.PRNGKey(0)
    k_ids, k_tab = jax.random.split(key)

    # Deterministic parameter init (nn.Embedding default: N(0, 1)).
    tables = jax.random.normal(k_tab, (3, V, D), dtype=jnp.float32)
    inputs = jax.random.randint(k_ids, (B, S), minval=0, maxval=V, dtype=jnp.int32)

    ve = value_embedding_forward(inputs, tables)

    # Block on the concrete outputs.
    for t in ve:
        if t is not None:
            jax.block_until_ready(t)

    # Correctness check against plain-JAX gather semantics (exact copy).
    for i in range(3):
        ref = tables[i][inputs]                       # (B, S, D)
        assert jnp.allclose(ve[i], ref), f"mismatch on table {i}"
        assert ve[i + 9] is ve[i]                     # reused tensors, like the PyTorch list
    assert all(ve[j] is None for j in range(3, 9))
    assert len(ve) == 12

    print("KERNEL_OK")
</pallas_src>

<mosaic_0001>
module attributes {stable_mosaic.version = 11 : i64} {
  func.func @kernel(%arg0: i32, %arg1: i32, %arg2: memref<16xi32, #tpu.memory_space<smem>>, %arg3: memref<192x128xf32, #tpu.memory_space<any>>, %arg4: memref<1x16x128xf32, #tpu.memory_space<vmem>>, %arg5: memref<1x!tpu.dma_semaphore, #tpu.memory_space<semaphore_mem>>) attributes {dimension_semantics = [#tpu.dimension_semantics<parallel>, #tpu.dimension_semantics<parallel>], iteration_bounds = array<i64: 3, 1>, scalar_prefetch = 1 : i64, scratch_operands = 1 : i64, tpu.core_type = #tpu.core_type<tc>, window_params = [{}, {transform_indices = @transform_1, window_bounds = array<i64: 1, 16, 128>}]} {
    %c16_i32 = arith.constant 16 : i32
    %0 = arith.muli %arg1, %c16_i32 : i32
    %c64_i32 = arith.constant 64 : i32
    %1 = arith.muli %arg0, %c64_i32 : i32
    %c0_i32 = arith.constant 0 : i32
    %2 = arith.addi %0, %c0_i32 : i32
    %3 = arith.index_cast %2 : i32 to index
    %4 = memref.load %arg2[%3] : memref<16xi32, #tpu.memory_space<smem>>
    %5 = arith.addi %1, %4 : i32
    %c0_i32_0 = arith.constant 0 : i32
    %c0_i32_1 = arith.constant 0 : i32
    %c0_i32_2 = arith.constant 0 : i32
    %6 = tpu.memref_slice %arg3[%5, %c0_i32_2] : memref<192x128xf32, #tpu.memory_space<any>> -> memref<1x128xf32, #tpu.memory_space<any>>
    %c0_i32_3 = arith.constant 0 : i32
    %c0_i32_4 = arith.constant 0 : i32
    %7 = tpu.memref_slice %arg4[%c0_i32_0, %c0_i32_3, %c0_i32_4] : memref<1x16x128xf32, #tpu.memory_space<vmem>> -> memref<1x1x128xf32, #tpu.memory_space<vmem>>
    %8 = tpu.memref_squeeze %7 : memref<1x1x128xf32, #tpu.memory_space<vmem>> -> memref<1x128xf32, #tpu.memory_space<vmem>>
    %9 = tpu.memref_slice %arg5[%c0_i32_1] : memref<1x!tpu.dma_semaphore, #tpu.memory_space<semaphore_mem>> -> memref<1x!tpu.dma_semaphore, #tpu.memory_space<semaphore_mem>>
    %10 = tpu.memref_squeeze %9 : memref<1x!tpu.dma_semaphore, #tpu.memory_space<semaphore_mem>> -> memref<!tpu.dma_semaphore, #tpu.memory_space<semaphore_mem>>
    tpu.enqueue_dma source(%6 : memref<1x128xf32, #tpu.memory_space<any>>) target(%8 : memref<1x128xf32, #tpu.memory_space<vmem>>) target_semaphore(%10 : memref<!tpu.dma_semaphore, #tpu.memory_space<semaphore_mem>>)
    %c64_i32_5 = arith.constant 64 : i32
    %11 = arith.muli %arg0, %c64_i32_5 : i32
    %c1_i32 = arith.constant 1 : i32
    %12 = arith.addi %0, %c1_i32 : i32
    %13 = arith.index_cast %12 : i32 to index
    %14 = memref.load %arg2[%13] : memref<16xi32, #tpu.memory_space<smem>>
    %15 = arith.addi %11, %14 : i32
    %c0_i32_6 = arith.constant 0 : i32
    %c0_i32_7 = arith.constant 0 : i32
    %c0_i32_8 = arith.constant 0 : i32
    %16 = tpu.memref_slice %arg3[%15, %c0_i32_8] : memref<192x128xf32, #tpu.memory_space<any>> -> memref<1x128xf32, #tpu.memory_space<any>>
    %c1_i32_9 = arith.constant 1 : i32
    %c0_i32_10 = arith.constant 0 : i32
    %17 = tpu.memref_slice %arg4[%c0_i32_6, %c1_i32_9, %c0_i32_10] : memref<1x16x128xf32, #tpu.memory_space<vmem>> -> memref<1x1x128xf32, #tpu.memory_space<vmem>>
    %18 = tpu.memref_squeeze %17 : memref<1x1x128xf32, #tpu.memory_space<vmem>> -> memref<1x128xf32, #tpu.memory_space<vmem>>
    %19 = tpu.memref_slice %arg5[%c0_i32_7] : memref<1x!tpu.dma_semaphore, #tpu.memory_space<semaphore_mem>> -> memref<1x!tpu.dma_semaphore, #tpu.memory_space<semaphore_mem>>
    %20 = tpu.memref_squeeze %19 : memref<1x!tpu.dma_semaphore, #tpu.memory_space<semaphore_mem>> -> memref<!tpu.dma_semaphore, #tpu.memory_space<semaphore_mem>>
    tpu.enqueue_dma source(%16 : memref<1x128xf32, #tpu.memory_space<any>>) target(%18 : memref<1x128xf32, #tpu.memory_space<vmem>>) target_semaphore(%20 : memref<!tpu.dma_semaphore, #tpu.memory_space<semaphore_mem>>)
    %c64_i32_11 = arith.constant 64 : i32
    %21 = arith.muli %arg0, %c64_i32_11 : i32
    %c2_i32 = arith.constant 2 : i32
    %22 = arith.addi %0, %c2_i32 : i32
    %23 = arith.index_cast %22 : i32 to index
    %24 = memref.load %arg2[%23] : memref<16xi32, #tpu.memory_space<smem>>
    %25 = arith.addi %21, %24 : i32
    %c0_i32_12 = arith.constant 0 : i32
    %c0_i32_13 = arith.constant 0 : i32
    %c0_i32_14 = arith.constant 0 : i32
    %26 = tpu.memref_slice %arg3[%25, %c0_i32_14] : memref<192x128xf32, #tpu.memory_space<any>> -> memref<1x128xf32, #tpu.memory_space<any>>
    %c2_i32_15 = arith.constant 2 : i32
    %c0_i32_16 = arith.constant 0 : i32
    %27 = tpu.memref_slice %arg4[%c0_i32_12, %c2_i32_15, %c0_i32_16] : memref<1x16x128xf32, #tpu.memory_space<vmem>> -> memref<1x1x128xf32, #tpu.memory_space<vmem>>
    %28 = tpu.memref_squeeze %27 : memref<1x1x128xf32, #tpu.memory_space<vmem>> -> memref<1x128xf32, #tpu.memory_space<vmem>>
    %29 = tpu.memref_slice %arg5[%c0_i32_13] : memref<1x!tpu.dma_semaphore, #tpu.memory_space<semaphore_mem>> -> memref<1x!tpu.dma_semaphore, #tpu.memory_space<semaphore_mem>>
    %30 = tpu.memref_squeeze %29 : memref<1x!tpu.dma_semaphore, #tpu.memory_space<semaphore_mem>> -> memref<!tpu.dma_semaphore, #tpu.memory_space<semaphore_mem>>
    tpu.enqueue_dma source(%26 : memref<1x128xf32, #tpu.memory_space<any>>) target(%28 : memref<1x128xf32, #tpu.memory_space<vmem>>) target_semaphore(%30 : memref<!tpu.dma_semaphore, #tpu.memory_space<semaphore_mem>>)
    %c64_i32_17 = arith.constant 64 : i32
    %31 = arith.muli %arg0, %c64_i32_17 : i32
    %c3_i32 = arith.constant 3 : i32
    %32 = arith.addi %0, %c3_i32 : i32
    %33 = arith.index_cast %32 : i32 to index
    %34 = memref.load %arg2[%33] : memref<16xi32, #tpu.memory_space<smem>>
    %35 = arith.addi %31, %34 : i32
    %c0_i32_18 = arith.constant 0 : i32
    %c0_i32_19 = arith.constant 0 : i32
    %c0_i32_20 = arith.constant 0 : i32
    %36 = tpu.memref_slice %arg3[%35, %c0_i32_20] : memref<192x128xf32, #tpu.memory_space<any>> -> memref<1x128xf32, #tpu.memory_space<any>>
    %c3_i32_21 = arith.constant 3 : i32
    %c0_i32_22 = arith.constant 0 : i32
    %37 = tpu.memref_slice %arg4[%c0_i32_18, %c3_i32_21, %c0_i32_22] : memref<1x16x128xf32, #tpu.memory_space<vmem>> -> memref<1x1x128xf32, #tpu.memory_space<vmem>>
    %38 = tpu.memref_squeeze %37 : memref<1x1x128xf32, #tpu.memory_space<vmem>> -> memref<1x128xf32, #tpu.memory_space<vmem>>
    %39 = tpu.memref_slice %arg5[%c0_i32_19] : memref<1x!tpu.dma_semaphore, #tpu.memory_space<semaphore_mem>> -> memref<1x!tpu.dma_semaphore, #tpu.memory_space<semaphore_mem>>
    %40 = tpu.memref_squeeze %39 : memref<1x!tpu.dma_semaphore, #tpu.memory_space<semaphore_mem>> -> memref<!tpu.dma_semaphore, #tpu.memory_space<semaphore_mem>>
    tpu.enqueue_dma source(%36 : memref<1x128xf32, #tpu.memory_space<any>>) target(%38 : memref<1x128xf32, #tpu.memory_space<vmem>>) target_semaphore(%40 : memref<!tpu.dma_semaphore, #tpu.memory_space<semaphore_mem>>)
    %c64_i32_23 = arith.constant 64 : i32
    %41 = arith.muli %arg0, %c64_i32_23 : i32
    %c4_i32 = arith.constant 4 : i32
    %42 = arith.addi %0, %c4_i32 : i32
    %43 = arith.index_cast %42 : i32 to index
    %44 = memref.load %arg2[%43] : memref<16xi32, #tpu.memory_space<smem>>
    %45 = arith.addi %41, %44 : i32
    %c0_i32_24 = arith.constant 0 : i32
    %c0_i32_25 = arith.constant 0 : i32
    %c0_i32_26 = arith.constant 0 : i32
    %46 = tpu.memref_slice %arg3[%45, %c0_i32_26] : memref<192x128xf32, #tpu.memory_space<any>> -> memref<1x128xf32, #tpu.memory_space<any>>
    %c4_i32_27 = arith.constant 4 : i32
    %c0_i32_28 = arith.constant 0 : i32
    %47 = tpu.memref_slice %arg4[%c0_i32_24, %c4_i32_27, %c0_i32_28] : memref<1x16x128xf32, #tpu.memory_space<vmem>> -> memref<1x1x128xf32, #tpu.memory_space<vmem>>
    %48 = tpu.memref_squeeze %47 : memref<1x1x128xf32, #tpu.memory_space<vmem>> -> memref<1x128xf32, #tpu.memory_space<vmem>>
    %49 = tpu.memref_slice %arg5[%c0_i32_25] : memref<1x!tpu.dma_semaphore, #tpu.memory_space<semaphore_mem>> -> memref<1x!tpu.dma_semaphore, #tpu.memory_space<semaphore_mem>>
    %50 = tpu.memref_squeeze %49 : memref<1x!tpu.dma_semaphore, #tpu.memory_space<semaphore_mem>> -> memref<!tpu.dma_semaphore, #tpu.memory_space<semaphore_mem>>
    tpu.enqueue_dma source(%46 : memref<1x128xf32, #tpu.memory_space<any>>) target(%48 : memref<1x128xf32, #tpu.memory_space<vmem>>) target_semaphore(%50 : memref<!tpu.dma_semaphore, #tpu.memory_space<semaphore_mem>>)
    %c64_i32_29 = arith.constant 64 : i32
    %51 = arith.muli %arg0, %c64_i32_29 : i32
    %c5_i32 = arith.constant 5 : i32
    %52 = arith.addi %0, %c5_i32 : i32
    %53 = arith.index_cast %52 : i32 to index
    %54 = memref.load %arg2[%53] : memref<16xi32, #tpu.memory_space<smem>>
    %55 = arith.addi %51, %54 : i32
    %c0_i32_30 = arith.constant 0 : i32
    %c0_i32_31 = arith.constant 0 : i32
    %c0_i32_32 = arith.constant 0 : i32
    %56 = tpu.memref_slice %arg3[%55, %c0_i32_32] : memref<192x128xf32, #tpu.memory_space<any>> -> memref<1x128xf32, #tpu.memory_space<any>>
    %c5_i32_33 = arith.constant 5 : i32
    %c0_i32_34 = arith.constant 0 : i32
    %57 = tpu.memref_slice %arg4[%c0_i32_30, %c5_i32_33, %c0_i32_34] : memref<1x16x128xf32, #tpu.memory_space<vmem>> -> memref<1x1x128xf32, #tpu.memory_space<vmem>>
    %58 = tpu.memref_squeeze %57 : memref<1x1x128xf32, #tpu.memory_space<vmem>> -> memref<1x128xf32, #tpu.memory_space<vmem>>
    %59 = tpu.memref_slice %arg5[%c0_i32_31] : memref<1x!tpu.dma_semaphore, #tpu.memory_space<semaphore_mem>> -> memref<1x!tpu.dma_semaphore, #tpu.memory_space<semaphore_mem>>
    %60 = tpu.memref_squeeze %59 : memref<1x!tpu.dma_semaphore, #tpu.memory_space<semaphore_mem>> -> memref<!tpu.dma_semaphore, #tpu.memory_space<semaphore_mem>>
    tpu.enqueue_dma source(%56 : memref<1x128xf32, #tpu.memory_space<any>>) target(%58 : memref<1x128xf32, #tpu.memory_space<vmem>>) target_semaphore(%60 : memref<!tpu.dma_semaphore, #tpu.memory_space<semaphore_mem>>)
    %c64_i32_35 = arith.constant 64 : i32
    %61 = arith.muli %arg0, %c64_i32_35 : i32
    %c6_i32 = arith.constant 6 : i32
    %62 = arith.addi %0, %c6_i32 : i32
    %63 = arith.index_cast %62 : i32 to index
    %64 = memref.load %arg2[%63] : memref<16xi32, #tpu.memory_space<smem>>
    %65 = arith.addi %61, %64 : i32
    %c0_i32_36 = arith.constant 0 : i32
    %c0_i32_37 = arith.constant 0 : i32
    %c0_i32_38 = arith.constant 0 : i32
    %66 = tpu.memref_slice %arg3[%65, %c0_i32_38] : memref<192x128xf32, #tpu.memory_space<any>> -> memref<1x128xf32, #tpu.memory_space<any>>
    %c6_i32_39 = arith.constant 6 : i32
    %c0_i32_40 = arith.constant 0 : i32
    %67 = tpu.memref_slice %arg4[%c0_i32_36, %c6_i32_39, %c0_i32_40] : memref<1x16x128xf32, #tpu.memory_space<vmem>> -> memref<1x1x128xf32, #tpu.memory_space<vmem>>
    %68 = tpu.memref_squeeze %67 : memref<1x1x128xf32, #tpu.memory_space<vmem>> -> memref<1x128xf32, #tpu.memory_space<vmem>>
    %69 = tpu.memref_slice %arg5[%c0_i32_37] : memref<1x!tpu.dma_semaphore, #tpu.memory_space<semaphore_mem>> -> memref<1x!tpu.dma_semaphore, #tpu.memory_space<semaphore_mem>>
    %70 = tpu.memref_squeeze %69 : memref<1x!tpu.dma_semaphore, #tpu.memory_space<semaphore_mem>> -> memref<!tpu.dma_semaphore, #tpu.memory_space<semaphore_mem>>
    tpu.enqueue_dma source(%66 : memref<1x128xf32, #tpu.memory_space<any>>) target(%68 : memref<1x128xf32, #tpu.memory_space<vmem>>) target_semaphore(%70 : memref<!tpu.dma_semaphore, #tpu.memory_space<semaphore_mem>>)
    %c64_i32_41 = arith.constant 64 : i32
    %71 = arith.muli %arg0, %c64_i32_41 : i32
    %c7_i32 = arith.constant 7 : i32
    %72 = arith.addi %0, %c7_i32 : i32
    %73 = arith.index_cast %72 : i32 to index
    %74 = memref.load %arg2[%73] : memref<16xi32, #tpu.memory_space<smem>>
    %75 = arith.addi %71, %74 : i32
    %c0_i32_42 = arith.constant 0 : i32
    %c0_i32_43 = arith.constant 0 : i32
    %c0_i32_44 = arith.constant 0 : i32
    %76 = tpu.memref_slice %arg3[%75, %c0_i32_44] : memref<192x128xf32, #tpu.memory_space<any>> -> memref<1x128xf32, #tpu.memory_space<any>>
    %c7_i32_45 = arith.constant 7 : i32
    %c0_i32_46 = arith.constant 0 : i32
    %77 = tpu.memref_slice %arg4[%c0_i32_42, %c7_i32_45, %c0_i32_46] : memref<1x16x128xf32, #tpu.memory_space<vmem>> -> memref<1x1x128xf32, #tpu.memory_space<vmem>>
    %78 = tpu.memref_squeeze %77 : memref<1x1x128xf32, #tpu.memory_space<vmem>> -> memref<1x128xf32, #tpu.memory_space<vmem>>
    %79 = tpu.memref_slice %arg5[%c0_i32_43] : memref<1x!tpu.dma_semaphore, #tpu.memory_space<semaphore_mem>> -> memref<1x!tpu.dma_semaphore, #tpu.memory_space<semaphore_mem>>
    %80 = tpu.memref_squeeze %79 : memref<1x!tpu.dma_semaphore, #tpu.memory_space<semaphore_mem>> -> memref<!tpu.dma_semaphore, #tpu.memory_space<semaphore_mem>>
    tpu.enqueue_dma source(%76 : memref<1x128xf32, #tpu.memory_space<any>>) target(%78 : memref<1x128xf32, #tpu.memory_space<vmem>>) target_semaphore(%80 : memref<!tpu.dma_semaphore, #tpu.memory_space<semaphore_mem>>)
    %c64_i32_47 = arith.constant 64 : i32
    %81 = arith.muli %arg0, %c64_i32_47 : i32
    %c8_i32 = arith.constant 8 : i32
    %82 = arith.addi %0, %c8_i32 : i32
    %83 = arith.index_cast %82 : i32 to index
    %84 = memref.load %arg2[%83] : memref<16xi32, #tpu.memory_space<smem>>
    %85 = arith.addi %81, %84 : i32
    %c0_i32_48 = arith.constant 0 : i32
    %c0_i32_49 = arith.constant 0 : i32
    %c0_i32_50 = arith.constant 0 : i32
    %86 = tpu.memref_slice %arg3[%85, %c0_i32_50] : memref<192x128xf32, #tpu.memory_space<any>> -> memref<1x128xf32, #tpu.memory_space<any>>
    %c8_i32_51 = arith.constant 8 : i32
    %c0_i32_52 = arith.constant 0 : i32
    %87 = tpu.memref_slice %arg4[%c0_i32_48, %c8_i32_51, %c0_i32_52] : memref<1x16x128xf32, #tpu.memory_space<vmem>> -> memref<1x1x128xf32, #tpu.memory_space<vmem>>
    %88 = tpu.memref_squeeze %87 : memref<1x1x128xf32, #tpu.memory_space<vmem>> -> memref<1x128xf32, #tpu.memory_space<vmem>>
    %89 = tpu.memref_slice %arg5[%c0_i32_49] : memref<1x!tpu.dma_semaphore, #tpu.memory_space<semaphore_mem>> -> memref<1x!tpu.dma_semaphore, #tpu.memory_space<semaphore_mem>>
    %90 = tpu.memref_squeeze %89 : memref<1x!tpu.dma_semaphore, #tpu.memory_space<semaphore_mem>> -> memref<!tpu.dma_semaphore, #tpu.memory_space<semaphore_mem>>
    tpu.enqueue_dma source(%86 : memref<1x128xf32, #tpu.memory_space<any>>) target(%88 : memref<1x128xf32, #tpu.memory_space<vmem>>) target_semaphore(%90 : memref<!tpu.dma_semaphore, #tpu.memory_space<semaphore_mem>>)
    %c64_i32_53 = arith.constant 64 : i32
    %91 = arith.muli %arg0, %c64_i32_53 : i32
    %c9_i32 = arith.constant 9 : i32
    %92 = arith.addi %0, %c9_i32 : i32
    %93 = arith.index_cast %92 : i32 to index
    %94 = memref.load %arg2[%93] : memref<16xi32, #tpu.memory_space<smem>>
    %95 = arith.addi %91, %94 : i32
    %c0_i32_54 = arith.constant 0 : i32
    %c0_i32_55 = arith.constant 0 : i32
    %c0_i32_56 = arith.constant 0 : i32
    %96 = tpu.memref_slice %arg3[%95, %c0_i32_56] : memref<192x128xf32, #tpu.memory_space<any>> -> memref<1x128xf32, #tpu.memory_space<any>>
    %c9_i32_57 = arith.constant 9 : i32
    %c0_i32_58 = arith.constant 0 : i32
    %97 = tpu.memref_slice %arg4[%c0_i32_54, %c9_i32_57, %c0_i32_58] : memref<1x16x128xf32, #tpu.memory_space<vmem>> -> memref<1x1x128xf32, #tpu.memory_space<vmem>>
    %98 = tpu.memref_squeeze %97 : memref<1x1x128xf32, #tpu.memory_space<vmem>> -> memref<1x128xf32, #tpu.memory_space<vmem>>
    %99 = tpu.memref_slice %arg5[%c0_i32_55] : memref<1x!tpu.dma_semaphore, #tpu.memory_space<semaphore_mem>> -> memref<1x!tpu.dma_semaphore, #tpu.memory_space<semaphore_mem>>
    %100 = tpu.memref_squeeze %99 : memref<1x!tpu.dma_semaphore, #tpu.memory_space<semaphore_mem>> -> memref<!tpu.dma_semaphore, #tpu.memory_space<semaphore_mem>>
    tpu.enqueue_dma source(%96 : memref<1x128xf32, #tpu.memory_space<any>>) target(%98 : memref<1x128xf32, #tpu.memory_space<vmem>>) target_semaphore(%100 : memref<!tpu.dma_semaphore, #tpu.memory_space<semaphore_mem>>)
    %c64_i32_59 = arith.constant 64 : i32
    %101 = arith.muli %arg0, %c64_i32_59 : i32
    %c10_i32 = arith.constant 10 : i32
    %102 = arith.addi %0, %c10_i32 : i32
    %103 = arith.index_cast %102 : i32 to index
    %104 = memref.load %arg2[%103] : memref<16xi32, #tpu.memory_space<smem>>
    %105 = arith.addi %101, %104 : i32
    %c0_i32_60 = arith.constant 0 : i32
    %c0_i32_61 = arith.constant 0 : i32
    %c0_i32_62 = arith.constant 0 : i32
    %106 = tpu.memref_slice %arg3[%105, %c0_i32_62] : memref<192x128xf32, #tpu.memory_space<any>> -> memref<1x128xf32, #tpu.memory_space<any>>
    %c10_i32_63 = arith.constant 10 : i32
    %c0_i32_64 = arith.constant 0 : i32
    %107 = tpu.memref_slice %arg4[%c0_i32_60, %c10_i32_63, %c0_i32_64] : memref<1x16x128xf32, #tpu.memory_space<vmem>> -> memref<1x1x128xf32, #tpu.memory_space<vmem>>
    %108 = tpu.memref_squeeze %107 : memref<1x1x128xf32, #tpu.memory_space<vmem>> -> memref<1x128xf32, #tpu.memory_space<vmem>>
    %109 = tpu.memref_slice %arg5[%c0_i32_61] : memref<1x!tpu.dma_semaphore, #tpu.memory_space<semaphore_mem>> -> memref<1x!tpu.dma_semaphore, #tpu.memory_space<semaphore_mem>>
    %110 = tpu.memref_squeeze %109 : memref<1x!tpu.dma_semaphore, #tpu.memory_space<semaphore_mem>> -> memref<!tpu.dma_semaphore, #tpu.memory_space<semaphore_mem>>
    tpu.enqueue_dma source(%106 : memref<1x128xf32, #tpu.memory_space<any>>) target(%108 : memref<1x128xf32, #tpu.memory_space<vmem>>) target_semaphore(%110 : memref<!tpu.dma_semaphore, #tpu.memory_space<semaphore_mem>>)
    %c64_i32_65 = arith.constant 64 : i32
    %111 = arith.muli %arg0, %c64_i32_65 : i32
    %c11_i32 = arith.constant 11 : i32
    %112 = arith.addi %0, %c11_i32 : i32
    %113 = arith.index_cast %112 : i32 to index
    %114 = memref.load %arg2[%113] : memref<16xi32, #tpu.memory_space<smem>>
    %115 = arith.addi %111, %114 : i32
    %c0_i32_66 = arith.constant 0 : i32
    %c0_i32_67 = arith.constant 0 : i32
    %c0_i32_68 = arith.constant 0 : i32
    %116 = tpu.memref_slice %arg3[%115, %c0_i32_68] : memref<192x128xf32, #tpu.memory_space<any>> -> memref<1x128xf32, #tpu.memory_space<any>>
    %c11_i32_69 = arith.constant 11 : i32
    %c0_i32_70 = arith.constant 0 : i32
    %117 = tpu.memref_slice %arg4[%c0_i32_66, %c11_i32_69, %c0_i32_70] : memref<1x16x128xf32, #tpu.memory_space<vmem>> -> memref<1x1x128xf32, #tpu.memory_space<vmem>>
    %118 = tpu.memref_squeeze %117 : memref<1x1x128xf32, #tpu.memory_space<vmem>> -> memref<1x128xf32, #tpu.memory_space<vmem>>
    %119 = tpu.memref_slice %arg5[%c0_i32_67] : memref<1x!tpu.dma_semaphore, #tpu.memory_space<semaphore_mem>> -> memref<1x!tpu.dma_semaphore, #tpu.memory_space<semaphore_mem>>
    %120 = tpu.memref_squeeze %119 : memref<1x!tpu.dma_semaphore, #tpu.memory_space<semaphore_mem>> -> memref<!tpu.dma_semaphore, #tpu.memory_space<semaphore_mem>>
    tpu.enqueue_dma source(%116 : memref<1x128xf32, #tpu.memory_space<any>>) target(%118 : memref<1x128xf32, #tpu.memory_space<vmem>>) target_semaphore(%120 : memref<!tpu.dma_semaphore, #tpu.memory_space<semaphore_mem>>)
    %c64_i32_71 = arith.constant 64 : i32
    %121 = arith.muli %arg0, %c64_i32_71 : i32
    %c12_i32 = arith.constant 12 : i32
    %122 = arith.addi %0, %c12_i32 : i32
    %123 = arith.index_cast %122 : i32 to index
    %124 = memref.load %arg2[%123] : memref<16xi32, #tpu.memory_space<smem>>
    %125 = arith.addi %121, %124 : i32
    %c0_i32_72 = arith.constant 0 : i32
    %c0_i32_73 = arith.constant 0 : i32
    %c0_i32_74 = arith.constant 0 : i32
    %126 = tpu.memref_slice %arg3[%125, %c0_i32_74] : memref<192x128xf32, #tpu.memory_space<any>> -> memref<1x128xf32, #tpu.memory_space<any>>
    %c12_i32_75 = arith.constant 12 : i32
    %c0_i32_76 = arith.constant 0 : i32
    %127 = tpu.memref_slice %arg4[%c0_i32_72, %c12_i32_75, %c0_i32_76] : memref<1x16x128xf32, #tpu.memory_space<vmem>> -> memref<1x1x128xf32, #tpu.memory_space<vmem>>
    %128 = tpu.memref_squeeze %127 : memref<1x1x128xf32, #tpu.memory_space<vmem>> -> memref<1x128xf32, #tpu.memory_space<vmem>>
    %129 = tpu.memref_slice %arg5[%c0_i32_73] : memref<1x!tpu.dma_semaphore, #tpu.memory_space<semaphore_mem>> -> memref<1x!tpu.dma_semaphore, #tpu.memory_space<semaphore_mem>>
    %130 = tpu.memref_squeeze %129 : memref<1x!tpu.dma_semaphore, #tpu.memory_space<semaphore_mem>> -> memref<!tpu.dma_semaphore, #tpu.memory_space<semaphore_mem>>
    tpu.enqueue_dma source(%126 : memref<1x128xf32, #tpu.memory_space<any>>) target(%128 : memref<1x128xf32, #tpu.memory_space<vmem>>) target_semaphore(%130 : memref<!tpu.dma_semaphore, #tpu.memory_space<semaphore_mem>>)
    %c64_i32_77 = arith.constant 64 : i32
    %131 = arith.muli %arg0, %c64_i32_77 : i32
    %c13_i32 = arith.constant 13 : i32
    %132 = arith.addi %0, %c13_i32 : i32
    %133 = arith.index_cast %132 : i32 to index
    %134 = memref.load %arg2[%133] : memref<16xi32, #tpu.memory_space<smem>>
    %135 = arith.addi %131, %134 : i32
    %c0_i32_78 = arith.constant 0 : i32
    %c0_i32_79 = arith.constant 0 : i32
    %c0_i32_80 = arith.constant 0 : i32
    %136 = tpu.memref_slice %arg3[%135, %c0_i32_80] : memref<192x128xf32, #tpu.memory_space<any>> -> memref<1x128xf32, #tpu.memory_space<any>>
    %c13_i32_81 = arith.constant 13 : i32
    %c0_i32_82 = arith.constant 0 : i32
    %137 = tpu.memref_slice %arg4[%c0_i32_78, %c13_i32_81, %c0_i32_82] : memref<1x16x128xf32, #tpu.memory_space<vmem>> -> memref<1x1x128xf32, #tpu.memory_space<vmem>>
    %138 = tpu.memref_squeeze %137 : memref<1x1x128xf32, #tpu.memory_space<vmem>> -> memref<1x128xf32, #tpu.memory_space<vmem>>
    %139 = tpu.memref_slice %arg5[%c0_i32_79] : memref<1x!tpu.dma_semaphore, #tpu.memory_space<semaphore_mem>> -> memref<1x!tpu.dma_semaphore, #tpu.memory_space<semaphore_mem>>
    %140 = tpu.memref_squeeze %139 : memref<1x!tpu.dma_semaphore, #tpu.memory_space<semaphore_mem>> -> memref<!tpu.dma_semaphore, #tpu.memory_space<semaphore_mem>>
    tpu.enqueue_dma source(%136 : memref<1x128xf32, #tpu.memory_space<any>>) target(%138 : memref<1x128xf32, #tpu.memory_space<vmem>>) target_semaphore(%140 : memref<!tpu.dma_semaphore, #tpu.memory_space<semaphore_mem>>)
    %c64_i32_83 = arith.constant 64 : i32
    %141 = arith.muli %arg0, %c64_i32_83 : i32
    %c14_i32 = arith.constant 14 : i32
    %142 = arith.addi %0, %c14_i32 : i32
    %143 = arith.index_cast %142 : i32 to index
    %144 = memref.load %arg2[%143] : memref<16xi32, #tpu.memory_space<smem>>
    %145 = arith.addi %141, %144 : i32
    %c0_i32_84 = arith.constant 0 : i32
    %c0_i32_85 = arith.constant 0 : i32
    %c0_i32_86 = arith.constant 0 : i32
    %146 = tpu.memref_slice %arg3[%145, %c0_i32_86] : memref<192x128xf32, #tpu.memory_space<any>> -> memref<1x128xf32, #tpu.memory_space<any>>
    %c14_i32_87 = arith.constant 14 : i32
    %c0_i32_88 = arith.constant 0 : i32
    %147 = tpu.memref_slice %arg4[%c0_i32_84, %c14_i32_87, %c0_i32_88] : memref<1x16x128xf32, #tpu.memory_space<vmem>> -> memref<1x1x128xf32, #tpu.memory_space<vmem>>
    %148 = tpu.memref_squeeze %147 : memref<1x1x128xf32, #tpu.memory_space<vmem>> -> memref<1x128xf32, #tpu.memory_space<vmem>>
    %149 = tpu.memref_slice %arg5[%c0_i32_85] : memref<1x!tpu.dma_semaphore, #tpu.memory_space<semaphore_mem>> -> memref<1x!tpu.dma_semaphore, #tpu.memory_space<semaphore_mem>>
    %150 = tpu.memref_squeeze %149 : memref<1x!tpu.dma_semaphore, #tpu.memory_space<semaphore_mem>> -> memref<!tpu.dma_semaphore, #tpu.memory_space<semaphore_mem>>
    tpu.enqueue_dma source(%146 : memref<1x128xf32, #tpu.memory_space<any>>) target(%148 : memref<1x128xf32, #tpu.memory_space<vmem>>) target_semaphore(%150 : memref<!tpu.dma_semaphore, #tpu.memory_space<semaphore_mem>>)
    %c64_i32_89 = arith.constant 64 : i32
    %151 = arith.muli %arg0, %c64_i32_89 : i32
    %c15_i32 = arith.constant 15 : i32
    %152 = arith.addi %0, %c15_i32 : i32
    %153 = arith.index_cast %152 : i32 to index
    %154 = memref.load %arg2[%153] : memref<16xi32, #tpu.memory_space<smem>>
    %155 = arith.addi %151, %154 : i32
    %c0_i32_90 = arith.constant 0 : i32
    %c0_i32_91 = arith.constant 0 : i32
    %c0_i32_92 = arith.constant 0 : i32
    %156 = tpu.memref_slice %arg3[%155, %c0_i32_92] : memref<192x128xf32, #tpu.memory_space<any>> -> memref<1x128xf32, #tpu.memory_space<any>>
    %c15_i32_93 = arith.constant 15 : i32
    %c0_i32_94 = arith.constant 0 : i32
    %157 = tpu.memref_slice %arg4[%c0_i32_90, %c15_i32_93, %c0_i32_94] : memref<1x16x128xf32, #tpu.memory_space<vmem>> -> memref<1x1x128xf32, #tpu.memory_space<vmem>>
    %158 = tpu.memref_squeeze %157 : memref<1x1x128xf32, #tpu.memory_space<vmem>> -> memref<1x128xf32, #tpu.memory_space<vmem>>
    %159 = tpu.memref_slice %arg5[%c0_i32_91] : memref<1x!tpu.dma_semaphore, #tpu.memory_space<semaphore_mem>> -> memref<1x!tpu.dma_semaphore, #tpu.memory_space<semaphore_mem>>
    %160 = tpu.memref_squeeze %159 : memref<1x!tpu.dma_semaphore, #tpu.memory_space<semaphore_mem>> -> memref<!tpu.dma_semaphore, #tpu.memory_space<semaphore_mem>>
    tpu.enqueue_dma source(%156 : memref<1x128xf32, #tpu.memory_space<any>>) target(%158 : memref<1x128xf32, #tpu.memory_space<vmem>>) target_semaphore(%160 : memref<!tpu.dma_semaphore, #tpu.memory_space<semaphore_mem>>)
    %c0_i32_95 = arith.constant 0 : i32
    %c0_i32_96 = arith.constant 0 : i32
    %c0_i32_97 = arith.constant 0 : i32
    %161 = tpu.memref_slice %arg3[%5, %c0_i32_97] : memref<192x128xf32, #tpu.memory_space<any>> -> memref<1x128xf32, #tpu.memory_space<any>>
    %c0_i32_98 = arith.constant 0 : i32
    %c0_i32_99 = arith.constant 0 : i32
    %162 = tpu.memref_slice %arg4[%c0_i32_95, %c0_i32_98, %c0_i32_99] : memref<1x16x128xf32, #tpu.memory_space<vmem>> -> memref<1x1x128xf32, #tpu.memory_space<vmem>>
    %163 = tpu.memref_squeeze %162 : memref<1x1x128xf32, #tpu.memory_space<vmem>> -> memref<1x128xf32, #tpu.memory_space<vmem>>
    %164 = tpu.memref_slice %arg5[%c0_i32_96] : memref<1x!tpu.dma_semaphore, #tpu.memory_space<semaphore_mem>> -> memref<1x!tpu.dma_semaphore, #tpu.memory_space<semaphore_mem>>
    %165 = tpu.memref_squeeze %164 : memref<1x!tpu.dma_semaphore, #tpu.memory_space<semaphore_mem>> -> memref<!tpu.dma_semaphore, #tpu.memory_space<semaphore_mem>>
    tpu.wait_dma2 semaphore(%165 : memref<!tpu.dma_semaphore, #tpu.memory_space<semaphore_mem>>) src(%161 : memref<1x128xf32, #tpu.memory_space<any>>) dst(%163 : memref<1x128xf32, #tpu.memory_space<vmem>>)
    %c0_i32_100 = arith.constant 0 : i32
    %c0_i32_101 = arith.constant 0 : i32
    %c0_i32_102 = arith.constant 0 : i32
    %166 = tpu.memref_slice %arg3[%15, %c0_i32_102] : memref<192x128xf32, #tpu.memory_space<any>> -> memref<1x128xf32, #tpu.memory_space<any>>
    %c1_i32_103 = arith.constant 1 : i32
    %c0_i32_104 = arith.constant 0 : i32
    %167 = tpu.memref_slice %arg4[%c0_i32_100, %c1_i32_103, %c0_i32_104] : memref<1x16x128xf32, #tpu.memory_space<vmem>> -> memref<1x1x128xf32, #tpu.memory_space<vmem>>
    %168 = tpu.memref_squeeze %167 : memref<1x1x128xf32, #tpu.memory_space<vmem>> -> memref<1x128xf32, #tpu.memory_space<vmem>>
    %169 = tpu.memref_slice %arg5[%c0_i32_101] : memref<1x!tpu.dma_semaphore, #tpu.memory_space<semaphore_mem>> -> memref<1x!tpu.dma_semaphore, #tpu.memory_space<semaphore_mem>>
    %170 = tpu.memref_squeeze %169 : memref<1x!tpu.dma_semaphore, #tpu.memory_space<semaphore_mem>> -> memref<!tpu.dma_semaphore, #tpu.memory_space<semaphore_mem>>
    tpu.wait_dma2 semaphore(%170 : memref<!tpu.dma_semaphore, #tpu.memory_space<semaphore_mem>>) src(%166 : memref<1x128xf32, #tpu.memory_space<any>>) dst(%168 : memref<1x128xf32, #tpu.memory_space<vmem>>)
    %c0_i32_105 = arith.constant 0 : i32
    %c0_i32_106 = arith.constant 0 : i32
    %c0_i32_107 = arith.constant 0 : i32
    %171 = tpu.memref_slice %arg3[%25, %c0_i32_107] : memref<192x128xf32, #tpu.memory_space<any>> -> memref<1x128xf32, #tpu.memory_space<any>>
    %c2_i32_108 = arith.constant 2 : i32
    %c0_i32_109 = arith.constant 0 : i32
    %172 = tpu.memref_slice %arg4[%c0_i32_105, %c2_i32_108, %c0_i32_109] : memref<1x16x128xf32, #tpu.memory_space<vmem>> -> memref<1x1x128xf32, #tpu.memory_space<vmem>>
    %173 = tpu.memref_squeeze %172 : memref<1x1x128xf32, #tpu.memory_space<vmem>> -> memref<1x128xf32, #tpu.memory_space<vmem>>
    %174 = tpu.memref_slice %arg5[%c0_i32_106] : memref<1x!tpu.dma_semaphore, #tpu.memory_space<semaphore_mem>> -> memref<1x!tpu.dma_semaphore, #tpu.memory_space<semaphore_mem>>
    %175 = tpu.memref_squeeze %174 : memref<1x!tpu.dma_semaphore, #tpu.memory_space<semaphore_mem>> -> memref<!tpu.dma_semaphore, #tpu.memory_space<semaphore_mem>>
    tpu.wait_dma2 semaphore(%175 : memref<!tpu.dma_semaphore, #tpu.memory_space<semaphore_mem>>) src(%171 : memref<1x128xf32, #tpu.memory_space<any>>) dst(%173 : memref<1x128xf32, #tpu.memory_space<vmem>>)
    %c0_i32_110 = arith.constant 0 : i32
    %c0_i32_111 = arith.constant 0 : i32
    %c0_i32_112 = arith.constant 0 : i32
    %176 = tpu.memref_slice %arg3[%35, %c0_i32_112] : memref<192x128xf32, #tpu.memory_space<any>> -> memref<1x128xf32, #tpu.memory_space<any>>
    %c3_i32_113 = arith.constant 3 : i32
    %c0_i32_114 = arith.constant 0 : i32
    %177 = tpu.memref_slice %arg4[%c0_i32_110, %c3_i32_113, %c0_i32_114] : memref<1x16x128xf32, #tpu.memory_space<vmem>> -> memref<1x1x128xf32, #tpu.memory_space<vmem>>
    %178 = tpu.memref_squeeze %177 : memref<1x1x128xf32, #tpu.memory_space<vmem>> -> memref<1x128xf32, #tpu.memory_space<vmem>>
    %179 = tpu.memref_slice %arg5[%c0_i32_111] : memref<1x!tpu.dma_semaphore, #tpu.memory_space<semaphore_mem>> -> memref<1x!tpu.dma_semaphore, #tpu.memory_space<semaphore_mem>>
    %180 = tpu.memref_squeeze %179 : memref<1x!tpu.dma_semaphore, #tpu.memory_space<semaphore_mem>> -> memref<!tpu.dma_semaphore, #tpu.memory_space<semaphore_mem>>
    tpu.wait_dma2 semaphore(%180 : memref<!tpu.dma_semaphore, #tpu.memory_space<semaphore_mem>>) src(%176 : memref<1x128xf32, #tpu.memory_space<any>>) dst(%178 : memref<1x128xf32, #tpu.memory_space<vmem>>)
    %c0_i32_115 = arith.constant 0 : i32
    %c0_i32_116 = arith.constant 0 : i32
    %c0_i32_117 = arith.constant 0 : i32
    %181 = tpu.memref_slice %arg3[%45, %c0_i32_117] : memref<192x128xf32, #tpu.memory_space<any>> -> memref<1x128xf32, #tpu.memory_space<any>>
    %c4_i32_118 = arith.constant 4 : i32
    %c0_i32_119 = arith.constant 0 : i32
    %182 = tpu.memref_slice %arg4[%c0_i32_115, %c4_i32_118, %c0_i32_119] : memref<1x16x128xf32, #tpu.memory_space<vmem>> -> memref<1x1x128xf32, #tpu.memory_space<vmem>>
    %183 = tpu.memref_squeeze %182 : memref<1x1x128xf32, #tpu.memory_space<vmem>> -> memref<1x128xf32, #tpu.memory_space<vmem>>
    %184 = tpu.memref_slice %arg5[%c0_i32_116] : memref<1x!tpu.dma_semaphore, #tpu.memory_space<semaphore_mem>> -> memref<1x!tpu.dma_semaphore, #tpu.memory_space<semaphore_mem>>
    %185 = tpu.memref_squeeze %184 : memref<1x!tpu.dma_semaphore, #tpu.memory_space<semaphore_mem>> -> memref<!tpu.dma_semaphore, #tpu.memory_space<semaphore_mem>>
    tpu.wait_dma2 semaphore(%185 : memref<!tpu.dma_semaphore, #tpu.memory_space<semaphore_mem>>) src(%181 : memref<1x128xf32, #tpu.memory_space<any>>) dst(%183 : memref<1x128xf32, #tpu.memory_space<vmem>>)
    %c0_i32_120 = arith.constant 0 : i32
    %c0_i32_121 = arith.constant 0 : i32
    %c0_i32_122 = arith.constant 0 : i32
    %186 = tpu.memref_slice %arg3[%55, %c0_i32_122] : memref<192x128xf32, #tpu.memory_space<any>> -> memref<1x128xf32, #tpu.memory_space<any>>
    %c5_i32_123 = arith.constant 5 : i32
    %c0_i32_124 = arith.constant 0 : i32
    %187 = tpu.memref_slice %arg4[%c0_i32_120, %c5_i32_123, %c0_i32_124] : memref<1x16x128xf32, #tpu.memory_space<vmem>> -> memref<1x1x128xf32, #tpu.memory_space<vmem>>
    %188 = tpu.memref_squeeze %187 : memref<1x1x128xf32, #tpu.memory_space<vmem>> -> memref<1x128xf32, #tpu.memory_space<vmem>>
    %189 = tpu.memref_slice %arg5[%c0_i32_121] : memref<1x!tpu.dma_semaphore, #tpu.memory_space<semaphore_mem>> -> memref<1x!tpu.dma_semaphore, #tpu.memory_space<semaphore_mem>>
    %190 = tpu.memref_squeeze %189 : memref<1x!tpu.dma_semaphore, #tpu.memory_space<semaphore_mem>> -> memref<!tpu.dma_semaphore, #tpu.memory_space<semaphore_mem>>
    tpu.wait_dma2 semaphore(%190 : memref<!tpu.dma_semaphore, #tpu.memory_space<semaphore_mem>>) src(%186 : memref<1x128xf32, #tpu.memory_space<any>>) dst(%188 : memref<1x128xf32, #tpu.memory_space<vmem>>)
    %c0_i32_125 = arith.constant 0 : i32
    %c0_i32_126 = arith.constant 0 : i32
    %c0_i32_127 = arith.constant 0 : i32
    %191 = tpu.memref_slice %arg3[%65, %c0_i32_127] : memref<192x128xf32, #tpu.memory_space<any>> -> memref<1x128xf32, #tpu.memory_space<any>>
    %c6_i32_128 = arith.constant 6 : i32
    %c0_i32_129 = arith.constant 0 : i32
    %192 = tpu.memref_slice %arg4[%c0_i32_125, %c6_i32_128, %c0_i32_129] : memref<1x16x128xf32, #tpu.memory_space<vmem>> -> memref<1x1x128xf32, #tpu.memory_space<vmem>>
    %193 = tpu.memref_squeeze %192 : memref<1x1x128xf32, #tpu.memory_space<vmem>> -> memref<1x128xf32, #tpu.memory_space<vmem>>
    %194 = tpu.memref_slice %arg5[%c0_i32_126] : memref<1x!tpu.dma_semaphore, #tpu.memory_space<semaphore_mem>> -> memref<1x!tpu.dma_semaphore, #tpu.memory_space<semaphore_mem>>
    %195 = tpu.memref_squeeze %194 : memref<1x!tpu.dma_semaphore, #tpu.memory_space<semaphore_mem>> -> memref<!tpu.dma_semaphore, #tpu.memory_space<semaphore_mem>>
    tpu.wait_dma2 semaphore(%195 : memref<!tpu.dma_semaphore, #tpu.memory_space<semaphore_mem>>) src(%191 : memref<1x128xf32, #tpu.memory_space<any>>) dst(%193 : memref<1x128xf32, #tpu.memory_space<vmem>>)
    %c0_i32_130 = arith.constant 0 : i32
    %c0_i32_131 = arith.constant 0 : i32
    %c0_i32_132 = arith.constant 0 : i32
    %196 = tpu.memref_slice %arg3[%75, %c0_i32_132] : memref<192x128xf32, #tpu.memory_space<any>> -> memref<1x128xf32, #tpu.memory_space<any>>
    %c7_i32_133 = arith.constant 7 : i32
    %c0_i32_134 = arith.constant 0 : i32
    %197 = tpu.memref_slice %arg4[%c0_i32_130, %c7_i32_133, %c0_i32_134] : memref<1x16x128xf32, #tpu.memory_space<vmem>> -> memref<1x1x128xf32, #tpu.memory_space<vmem>>
    %198 = tpu.memref_squeeze %197 : memref<1x1x128xf32, #tpu.memory_space<vmem>> -> memref<1x128xf32, #tpu.memory_space<vmem>>
    %199 = tpu.memref_slice %arg5[%c0_i32_131] : memref<1x!tpu.dma_semaphore, #tpu.memory_space<semaphore_mem>> -> memref<1x!tpu.dma_semaphore, #tpu.memory_space<semaphore_mem>>
    %200 = tpu.memref_squeeze %199 : memref<1x!tpu.dma_semaphore, #tpu.memory_space<semaphore_mem>> -> memref<!tpu.dma_semaphore, #tpu.memory_space<semaphore_mem>>
    tpu.wait_dma2 semaphore(%200 : memref<!tpu.dma_semaphore, #tpu.memory_space<semaphore_mem>>) src(%196 : memref<1x128xf32, #tpu.memory_space<any>>) dst(%198 : memref<1x128xf32, #tpu.memory_space<vmem>>)
    %c0_i32_135 = arith.constant 0 : i32
    %c0_i32_136 = arith.constant 0 : i32
    %c0_i32_137 = arith.constant 0 : i32
    %201 = tpu.memref_slice %arg3[%85, %c0_i32_137] : memref<192x128xf32, #tpu.memory_space<any>> -> memref<1x128xf32, #tpu.memory_space<any>>
    %c8_i32_138 = arith.constant 8 : i32
    %c0_i32_139 = arith.constant 0 : i32
    %202 = tpu.memref_slice %arg4[%c0_i32_135, %c8_i32_138, %c0_i32_139] : memref<1x16x128xf32, #tpu.memory_space<vmem>> -> memref<1x1x128xf32, #tpu.memory_space<vmem>>
    %203 = tpu.memref_squeeze %202 : memref<1x1x128xf32, #tpu.memory_space<vmem>> -> memref<1x128xf32, #tpu.memory_space<vmem>>
    %204 = tpu.memref_slice %arg5[%c0_i32_136] : memref<1x!tpu.dma_semaphore, #tpu.memory_space<semaphore_mem>> -> memref<1x!tpu.dma_semaphore, #tpu.memory_space<semaphore_mem>>
    %205 = tpu.memref_squeeze %204 : memref<1x!tpu.dma_semaphore, #tpu.memory_space<semaphore_mem>> -> memref<!tpu.dma_semaphore, #tpu.memory_space<semaphore_mem>>
    tpu.wait_dma2 semaphore(%205 : memref<!tpu.dma_semaphore, #tpu.memory_space<semaphore_mem>>) src(%201 : memref<1x128xf32, #tpu.memory_space<any>>) dst(%203 : memref<1x128xf32, #tpu.memory_space<vmem>>)
    %c0_i32_140 = arith.constant 0 : i32
    %c0_i32_141 = arith.constant 0 : i32
    %c0_i32_142 = arith.constant 0 : i32
    %206 = tpu.memref_slice %arg3[%95, %c0_i32_142] : memref<192x128xf32, #tpu.memory_space<any>> -> memref<1x128xf32, #tpu.memory_space<any>>
    %c9_i32_143 = arith.constant 9 : i32
    %c0_i32_144 = arith.constant 0 : i32
    %207 = tpu.memref_slice %arg4[%c0_i32_140, %c9_i32_143, %c0_i32_144] : memref<1x16x128xf32, #tpu.memory_space<vmem>> -> memref<1x1x128xf32, #tpu.memory_space<vmem>>
    %208 = tpu.memref_squeeze %207 : memref<1x1x128xf32, #tpu.memory_space<vmem>> -> memref<1x128xf32, #tpu.memory_space<vmem>>
    %209 = tpu.memref_slice %arg5[%c0_i32_141] : memref<1x!tpu.dma_semaphore, #tpu.memory_space<semaphore_mem>> -> memref<1x!tpu.dma_semaphore, #tpu.memory_space<semaphore_mem>>
    %210 = tpu.memref_squeeze %209 : memref<1x!tpu.dma_semaphore, #tpu.memory_space<semaphore_mem>> -> memref<!tpu.dma_semaphore, #tpu.memory_space<semaphore_mem>>
    tpu.wait_dma2 semaphore(%210 : memref<!tpu.dma_semaphore, #tpu.memory_space<semaphore_mem>>) src(%206 : memref<1x128xf32, #tpu.memory_space<any>>) dst(%208 : memref<1x128xf32, #tpu.memory_space<vmem>>)
    %c0_i32_145 = arith.constant 0 : i32
    %c0_i32_146 = arith.constant 0 : i32
    %c0_i32_147 = arith.constant 0 : i32
    %211 = tpu.memref_slice %arg3[%105, %c0_i32_147] : memref<192x128xf32, #tpu.memory_space<any>> -> memref<1x128xf32, #tpu.memory_space<any>>
    %c10_i32_148 = arith.constant 10 : i32
    %c0_i32_149 = arith.constant 0 : i32
    %212 = tpu.memref_slice %arg4[%c0_i32_145, %c10_i32_148, %c0_i32_149] : memref<1x16x128xf32, #tpu.memory_space<vmem>> -> memref<1x1x128xf32, #tpu.memory_space<vmem>>
    %213 = tpu.memref_squeeze %212 : memref<1x1x128xf32, #tpu.memory_space<vmem>> -> memref<1x128xf32, #tpu.memory_space<vmem>>
    %214 = tpu.memref_slice %arg5[%c0_i32_146] : memref<1x!tpu.dma_semaphore, #tpu.memory_space<semaphore_mem>> -> memref<1x!tpu.dma_semaphore, #tpu.memory_space<semaphore_mem>>
    %215 = tpu.memref_squeeze %214 : memref<1x!tpu.dma_semaphore, #tpu.memory_space<semaphore_mem>> -> memref<!tpu.dma_semaphore, #tpu.memory_space<semaphore_mem>>
    tpu.wait_dma2 semaphore(%215 : memref<!tpu.dma_semaphore, #tpu.memory_space<semaphore_mem>>) src(%211 : memref<1x128xf32, #tpu.memory_space<any>>) dst(%213 : memref<1x128xf32, #tpu.memory_space<vmem>>)
    %c0_i32_150 = arith.constant 0 : i32
    %c0_i32_151 = arith.constant 0 : i32
    %c0_i32_152 = arith.constant 0 : i32
    %216 = tpu.memref_slice %arg3[%115, %c0_i32_152] : memref<192x128xf32, #tpu.memory_space<any>> -> memref<1x128xf32, #tpu.memory_space<any>>
    %c11_i32_153 = arith.constant 11 : i32
    %c0_i32_154 = arith.constant 0 : i32
    %217 = tpu.memref_slice %arg4[%c0_i32_150, %c11_i32_153, %c0_i32_154] : memref<1x16x128xf32, #tpu.memory_space<vmem>> -> memref<1x1x128xf32, #tpu.memory_space<vmem>>
    %218 = tpu.memref_squeeze %217 : memref<1x1x128xf32, #tpu.memory_space<vmem>> -> memref<1x128xf32, #tpu.memory_space<vmem>>
    %219 = tpu.memref_slice %arg5[%c0_i32_151] : memref<1x!tpu.dma_semaphore, #tpu.memory_space<semaphore_mem>> -> memref<1x!tpu.dma_semaphore, #tpu.memory_space<semaphore_mem>>
    %220 = tpu.memref_squeeze %219 : memref<1x!tpu.dma_semaphore, #tpu.memory_space<semaphore_mem>> -> memref<!tpu.dma_semaphore, #tpu.memory_space<semaphore_mem>>
    tpu.wait_dma2 semaphore(%220 : memref<!tpu.dma_semaphore, #tpu.memory_space<semaphore_mem>>) src(%216 : memref<1x128xf32, #tpu.memory_space<any>>) dst(%218 : memref<1x128xf32, #tpu.memory_space<vmem>>)
    %c0_i32_155 = arith.constant 0 : i32
    %c0_i32_156 = arith.constant 0 : i32
    %c0_i32_157 = arith.constant 0 : i32
    %221 = tpu.memref_slice %arg3[%125, %c0_i32_157] : memref<192x128xf32, #tpu.memory_space<any>> -> memref<1x128xf32, #tpu.memory_space<any>>
    %c12_i32_158 = arith.constant 12 : i32
    %c0_i32_159 = arith.constant 0 : i32
    %222 = tpu.memref_slice %arg4[%c0_i32_155, %c12_i32_158, %c0_i32_159] : memref<1x16x128xf32, #tpu.memory_space<vmem>> -> memref<1x1x128xf32, #tpu.memory_space<vmem>>
    %223 = tpu.memref_squeeze %222 : memref<1x1x128xf32, #tpu.memory_space<vmem>> -> memref<1x128xf32, #tpu.memory_space<vmem>>
    %224 = tpu.memref_slice %arg5[%c0_i32_156] : memref<1x!tpu.dma_semaphore, #tpu.memory_space<semaphore_mem>> -> memref<1x!tpu.dma_semaphore, #tpu.memory_space<semaphore_mem>>
    %225 = tpu.memref_squeeze %224 : memref<1x!tpu.dma_semaphore, #tpu.memory_space<semaphore_mem>> -> memref<!tpu.dma_semaphore, #tpu.memory_space<semaphore_mem>>
    tpu.wait_dma2 semaphore(%225 : memref<!tpu.dma_semaphore, #tpu.memory_space<semaphore_mem>>) src(%221 : memref<1x128xf32, #tpu.memory_space<any>>) dst(%223 : memref<1x128xf32, #tpu.memory_space<vmem>>)
    %c0_i32_160 = arith.constant 0 : i32
    %c0_i32_161 = arith.constant 0 : i32
    %c0_i32_162 = arith.constant 0 : i32
    %226 = tpu.memref_slice %arg3[%135, %c0_i32_162] : memref<192x128xf32, #tpu.memory_space<any>> -> memref<1x128xf32, #tpu.memory_space<any>>
    %c13_i32_163 = arith.constant 13 : i32
    %c0_i32_164 = arith.constant 0 : i32
    %227 = tpu.memref_slice %arg4[%c0_i32_160, %c13_i32_163, %c0_i32_164] : memref<1x16x128xf32, #tpu.memory_space<vmem>> -> memref<1x1x128xf32, #tpu.memory_space<vmem>>
    %228 = tpu.memref_squeeze %227 : memref<1x1x128xf32, #tpu.memory_space<vmem>> -> memref<1x128xf32, #tpu.memory_space<vmem>>
    %229 = tpu.memref_slice %arg5[%c0_i32_161] : memref<1x!tpu.dma_semaphore, #tpu.memory_space<semaphore_mem>> -> memref<1x!tpu.dma_semaphore, #tpu.memory_space<semaphore_mem>>
    %230 = tpu.memref_squeeze %229 : memref<1x!tpu.dma_semaphore, #tpu.memory_space<semaphore_mem>> -> memref<!tpu.dma_semaphore, #tpu.memory_space<semaphore_mem>>
    tpu.wait_dma2 semaphore(%230 : memref<!tpu.dma_semaphore, #tpu.memory_space<semaphore_mem>>) src(%226 : memref<1x128xf32, #tpu.memory_space<any>>) dst(%228 : memref<1x128xf32, #tpu.memory_space<vmem>>)
    %c0_i32_165 = arith.constant 0 : i32
    %c0_i32_166 = arith.constant 0 : i32
    %c0_i32_167 = arith.constant 0 : i32
    %231 = tpu.memref_slice %arg3[%145, %c0_i32_167] : memref<192x128xf32, #tpu.memory_space<any>> -> memref<1x128xf32, #tpu.memory_space<any>>
    %c14_i32_168 = arith.constant 14 : i32
    %c0_i32_169 = arith.constant 0 : i32
    %232 = tpu.memref_slice %arg4[%c0_i32_165, %c14_i32_168, %c0_i32_169] : memref<1x16x128xf32, #tpu.memory_space<vmem>> -> memref<1x1x128xf32, #tpu.memory_space<vmem>>
    %233 = tpu.memref_squeeze %232 : memref<1x1x128xf32, #tpu.memory_space<vmem>> -> memref<1x128xf32, #tpu.memory_space<vmem>>
    %234 = tpu.memref_slice %arg5[%c0_i32_166] : memref<1x!tpu.dma_semaphore, #tpu.memory_space<semaphore_mem>> -> memref<1x!tpu.dma_semaphore, #tpu.memory_space<semaphore_mem>>
    %235 = tpu.memref_squeeze %234 : memref<1x!tpu.dma_semaphore, #tpu.memory_space<semaphore_mem>> -> memref<!tpu.dma_semaphore, #tpu.memory_space<semaphore_mem>>
    tpu.wait_dma2 semaphore(%235 : memref<!tpu.dma_semaphore, #tpu.memory_space<semaphore_mem>>) src(%231 : memref<1x128xf32, #tpu.memory_space<any>>) dst(%233 : memref<1x128xf32, #tpu.memory_space<vmem>>)
    %c0_i32_170 = arith.constant 0 : i32
    %c0_i32_171 = arith.constant 0 : i32
    %c0_i32_172 = arith.constant 0 : i32
    %236 = tpu.memref_slice %arg3[%155, %c0_i32_172] : memref<192x128xf32, #tpu.memory_space<any>> -> memref<1x128xf32, #tpu.memory_space<any>>
    %c15_i32_173 = arith.constant 15 : i32
    %c0_i32_174 = arith.constant 0 : i32
    %237 = tpu.memref_slice %arg4[%c0_i32_170, %c15_i32_173, %c0_i32_174] : memref<1x16x128xf32, #tpu.memory_space<vmem>> -> memref<1x1x128xf32, #tpu.memory_space<vmem>>
    %238 = tpu.memref_squeeze %237 : memref<1x1x128xf32, #tpu.memory_space<vmem>> -> memref<1x128xf32, #tpu.memory_space<vmem>>
    %239 = tpu.memref_slice %arg5[%c0_i32_171] : memref<1x!tpu.dma_semaphore, #tpu.memory_space<semaphore_mem>> -> memref<1x!tpu.dma_semaphore, #tpu.memory_space<semaphore_mem>>
    %240 = tpu.memref_squeeze %239 : memref<1x!tpu.dma_semaphore, #tpu.memory_space<semaphore_mem>> -> memref<!tpu.dma_semaphore, #tpu.memory_space<semaphore_mem>>
    tpu.wait_dma2 semaphore(%240 : memref<!tpu.dma_semaphore, #tpu.memory_space<semaphore_mem>>) src(%236 : memref<1x128xf32, #tpu.memory_space<any>>) dst(%238 : memref<1x128xf32, #tpu.memory_space<vmem>>)
    return
  }
  func.func @transform_1(%arg0: i32, %arg1: i32, %arg2: memref<16xi32, #tpu.memory_space<smem>>) -> (i32, i32, i32) {
    %c0_i32 = arith.constant 0 : i32
    %c0_i32_0 = arith.constant 0 : i32
    return %arg0, %arg1, %c0_i32 : i32, i32, i32
  }
}

</mosaic_0001>

<bundles_post_ra>
// kernel: tpu_custom_call.1
= control target key start
LH: loop header
LB: loop body
LE: loop exit
PB: predicated region body
PF: predicated region fallthrough
CT: control target
= control target key end

     0   :  { %s1459_s0 = inlined_call_operand.hbm [shape: s32[16], index: 0, kind: input, shape index: {}]   ;;  %s1460_s1 = inlined_call_operand.hbm [shape: f32[192,128], index: 1, kind: input, shape index: {}]   ;;  %s1461_s2 = inlined_call_operand.hbm [shape: f32[3,16,128], index: 2, kind: output, shape index: {}]  }
   0x1   :  { %s593_s11 = scalar_lea.hbm %s1459_s0, 16 }
   0x2   :  { %p594_p0 = scmp.ne.s32.totalorder %s1459_s0, %s593_s11  ;;  %p597_p1 = scmp.lt.u32.totalorder %s593_s11, %s1459_s0 }
   0x4   :  { %p599_p2 = pnand %p597_p1, %p594_p0 }
   0x6   :  { %602 = shalt.err (!%p599_p2)  }
   0x7   :  { %s1055_s16 = smov [#allocation4]  }
   0x8   :  { %8 = dma.hbm_to_smem %s1459_s0, 16, %s1055_s16, [#allocation3] }
   0x9   :  { %1031 = dma.done.wait [#allocation3], 16 }
   0xa   :  { %1032 = vsyncadd [#allocation3], 4294967280 }
   0xb   :  { %10 = sfence }
   0xc   :  { %11 = vsyncpa [#allocation6], 0 }
   0xd   :  { %13 = vsyncpa [#allocation6 + $0x1], 0  ;;  %s1086_s19 = smov 0   ;;  %s1088_s20 = smov 0  }
   0xe   :  { %s1090_s21 = smov 0   ;;  %s1092_s22 = smov 0  }
   0xf LB: > { %s28_s0 = sadd.s32 1, %s1049_s21  ;;  %s508_s23 = sadd.s32 4294967295, %s1053_s22   ;;  %s1053_s22 = sphi %s1092_s22, %s19_s22   ;;  %s1049_s21 = sphi %s1090_s21, %s1472_s21   ;;  %s1045_s20 = sphi %s1088_s20, %s1474_s20   ;;  %s1041_s19 = sphi %s1086_s19, %s1473_s19  }
  0x10   : > { %p30_p3 = scmp.ge.s32.totalorder %s28_s0, 3  ;;  %p46_p4 = scmp.ne.s32.totalorder %s1045_s20, %s1041_s19 }
  0x11   : > { %s37_s24 = sadd.s32 1, %s1045_s20  ;;  %p47_p5 = scmp.eq.s32.totalorder %s508_s23, 2 }
  0x12   : > { %s1476_s0 = smov (%p30_p3, %s28_s0), 0  ;;  %p41_p6 = scmp.eq.s32.totalorder %s1053_s22, 2 }
  0x13   : > { %1465 = sst [smem:[#allocation44_spill]] %s1476_s0  ;;  %s32_s25 = ssub.s32 %s1049_s21, %s1476_s0 }
  0x14   : > { %p35_p7 = scmp.eq.s32.totalorder %s32_s25, 0  ;;  %p509_p8 = scmp.ne.s32.totalorder %s32_s25, 0 }
  0x15   : > { %p1116_p9 = por %p47_p5, %p46_p4  ;;  %p510_p11 = scmp.ge.s32.totalorder %s1053_s22, 3 }
  0x16   : > { %s1121_s27 = scalar_select %p35_p7, %s1045_s20, %s37_s24  }
  0x17   : > { %p1123_p10 = por %p509_p8, %p41_p6  ;;  %56 = sbr.rel (%p510_p11) target bundleno = 413 (0x19d), region = 12 }
  0x18   : > { %1467 = sst [smem:[#allocation45_spill]] %s1121_s27  ;;  %s1462_s29 = sand.u32 (!%p510_p11), 1, %s1045_s20  }
  0x19   : > { %s1130_s30 = sshll.u32 (!%p510_p11), %s1049_s21, 6  ;;  %s511_s3 = sshll.u32 (!%p510_p11), %s1462_s29, 4 }
  0x1a   : > { %s67_s4 = sld [smem:[#allocation4]] (!%p510_p11)  ;;  %s514_s5 = sld [smem:[#allocation4 + $0x1]] (!%p510_p11) }
  0x1b   : > { %s1134_s6 = scalar_lea.vmem (!%p510_p11), [#allocation5], %s511_s3  ;;  %s1142_s10 = sld [smem:[#allocation4 + $0x2]] (!%p510_p11) }
  0x1c   : > { %s78_s7 = sshll.u32 (!%p510_p11), %s1134_s6, 4  ;;  %s87_s8 = scalar_lea.vmem (!%p510_p11), %s1134_s6, 1 [#allocation5]  ;;  %s1138_s7 = int_to_ptr.vmem [resolvable:$true] %s78_s7 }
  0x1d   : > { %s95_s9 = sshll.u32 (!%p510_p11), %s87_s8, 4  ;;  %s104_s11 = scalar_lea.vmem (!%p510_p11), %s1134_s6, 2 [#allocation5]  ;;  %s1140_s9 = int_to_ptr.vmem [resolvable:$true] %s95_s9 }
  0x1e   : > { %s1145_s12 = sld [smem:[#allocation4 + $0x3]]  ;;  %s1148_s14 = sshll.u32 %s104_s11, 4  ;;  %s113_s14 = int_to_ptr.vmem [resolvable:$true] %s1148_s14 }
  0x1f   : > { %s1157_s29 = scalar_lea.hbm %s1460_s1, 3072 }
  0x20   : > { %s68_s13 = sadd.s32 %s1130_s30, %s67_s4  ;;  %s84_s16 = sadd.s32 %s514_s5, %s1130_s30 }
  0x21   : > { %s513_s15 = sshll.u32 %s68_s13, 4  ;;  %s515_s24 = sshll.u32 %s84_s16, 4 }
  0x22   : > { %s70_s23 = scalar_lea.hbm %s1460_s1, %s513_s15 }
  0x23   : > { %s603_s25 = scalar_lea.hbm %s70_s23, 16  ;;  %p606_p13 = scmp.lt.u32.totalorder %s70_s23, %s1460_s1 }
  0x24   : > { %p604_p12 = scmp.ne.s32.totalorder %s70_s23, %s603_s25  ;;  %p607_p0 = scmp.lt.u32.totalorder %s1157_s29, %s603_s25 }
  0x25   : > { %p609_p2 = scmp.lt.u32.totalorder %s603_s25, %s70_s23 }
  0x26   : > { %p608_p1 = por %p607_p0, %p606_p13 }
  0x28   : > { %p610_p3 = por %p609_p2, %p608_p1 }
  0x2a   : > { %p611_p4 = pnand %p610_p3, %p604_p12 }
  0x2c   : > { %614 = shalt.err (!%p611_p4)  }
  0x2d   : > { %s615_s4 = scalar_lea.vmem %s1138_s7, 16  ;;  %s1056_s5 = smov [#allocation5]  }
  0x2e   : > { %p616_p5 = scmp.ne.s32.totalorder %s1138_s7, %s615_s4  ;;  %s617_s11 = sshll.u32 %s1056_s5, 4  ;;  %s1165_s11 = int_to_ptr.vmem [resolvable:$false] %s617_s11 }
  0x2f   : > { %s1168_s0 = scalar_lea.vmem %s1165_s11, 512  ;;  %p1464_p6 = scmp.lt.s32.totalorder %s1138_s7, %s1165_s11 }
  0x30   : > { %p621_p7 = scmp.lt.s32.totalorder %s1168_s0, %s615_s4 }
  0x32   : > { %p622_p8 = por %p621_p7, %p1464_p6 }
  0x34   : > { %p623_p11 = pnand %p622_p8, %p616_p5 }
  0x36   : > { %626 = shalt.err (!%p623_p11)  }
  0x37   : > { %81 = dma.hbm_to_vmem [thread:$0]  %s70_s23, 16, %s1138_s7, [#allocation2] }
  0x38   : > { %s86_s15 = scalar_lea.hbm %s1460_s1, %s515_s24  ;;  %s101_s16 = sadd.s32 %s1142_s10, %s1130_s30 }
  0x39   : > { %s627_s17 = scalar_lea.hbm %s86_s15, 16  ;;  %p630_p13 = scmp.lt.u32.totalorder %s86_s15, %s1460_s1 }
  0x3a   : > { %p628_p12 = scmp.ne.s32.totalorder %s86_s15, %s627_s17  ;;  %p631_p0 = scmp.lt.u32.totalorder %s1157_s29, %s627_s17 }
  0x3b   : > { %p633_p2 = scmp.lt.u32.totalorder %s627_s17, %s86_s15 }
  0x3c   : > { %p632_p1 = por %p631_p0, %p630_p13 }
  0x3e   : > { %p634_p3 = por %p633_p2, %p632_p1 }
  0x40   : > { %p635_p4 = pnand %p634_p3, %p628_p12 }
  0x42   : > { %638 = shalt.err (!%p635_p4)  }
  0x43   : > { %s639_s23 = scalar_lea.vmem %s1140_s9, 16  ;;  %p644_p7 = scmp.lt.s32.totalorder %s1140_s9, %s1165_s11 }
  0x44   : > { %p640_p5 = scmp.ne.s32.totalorder %s1140_s9, %s639_s23  ;;  %p645_p8 = scmp.lt.s32.totalorder %s1168_s0, %s639_s23 }
  0x46   : > { %p646_p11 = por %p645_p8, %p644_p7 }
  0x48   : > { %p647_p6 = pnand %p646_p11, %p640_p5 }
  0x4a   : > { %650 = shalt.err (!%p647_p6)  }
  0x4b   : > { %98 = dma.hbm_to_vmem [thread:$0]  %s86_s15, 16, %s1140_s9, [#allocation2] }
  0x4c   : > { %s517_s10 = sshll.u32 %s101_s16, 4  ;;  %s118_s4 = sadd.s32 %s1145_s12, %s1130_s30 }
  0x4d   : > { %s103_s8 = scalar_lea.hbm %s1460_s1, %s517_s10 }
  0x4e   : > { %s651_s5 = scalar_lea.hbm %s103_s8, 16  ;;  %p654_p13 = scmp.lt.u32.totalorder %s103_s8, %s1460_s1 }
  0x4f   : > { %p652_p12 = scmp.ne.s32.totalorder %s103_s8, %s651_s5  ;;  %p655_p6 = scmp.lt.u32.totalorder %s1157_s29, %s651_s5 }
  0x50   : > { %p657_p1 = scmp.lt.u32.totalorder %s651_s5, %s103_s8 }
  0x51   : > { %p656_p0 = por %p655_p6, %p654_p13 }
  0x53   : > { %p658_p2 = por %p657_p1, %p656_p0 }
  0x55   : > { %p659_p3 = pnand %p658_p2, %p652_p12 }
  0x57   : > { %662 = shalt.err (!%p659_p3)  }
  0x58   : > { %s663_s9 = scalar_lea.vmem %s113_s14, 16  ;;  %p668_p5 = scmp.lt.s32.totalorder %s113_s14, %s1165_s11 }
  0x59   : > { %p664_p4 = scmp.ne.s32.totalorder %s113_s14, %s663_s9  ;;  %p669_p7 = scmp.lt.s32.totalorder %s1168_s0, %s663_s9 }
  0x5b   : > { %p670_p8 = por %p669_p7, %p668_p5 }
  0x5d   : > { %p671_p11 = pnand %p670_p8, %p664_p4 }
  0x5f   : > { %674 = shalt.err (!%p671_p11)  }
  0x60   : > { %115 = dma.hbm_to_vmem [thread:$0]  %s103_s8, 16, %s113_s14, [#allocation2] }
  0x61   : > { %s519_s12 = sshll.u32 %s118_s4, 4  ;;  %s121_s15 = scalar_lea.vmem %s1134_s6, 3 [#allocation5] }
  0x62   : > { %s120_s18 = scalar_lea.hbm %s1460_s1, %s519_s12  ;;  %s129_s25 = sshll.u32 %s121_s15, 4  ;;  %s130_s25 = int_to_ptr.vmem [resolvable:$true] %s129_s25 }
  0x63   : > { %s520_s23 = sld [smem:[#allocation4 + $0x4]]  ;;  %s675_s10 = scalar_lea.hbm %s120_s18, 16 }
  0x64   : > { %p676_p12 = scmp.ne.s32.totalorder %s120_s18, %s675_s10  ;;  %p678_p13 = scmp.lt.u32.totalorder %s120_s18, %s1460_s1 }
  0x65   : > { %p679_p6 = scmp.lt.u32.totalorder %s1157_s29, %s675_s10  ;;  %p681_p1 = scmp.lt.u32.totalorder %s675_s10, %s120_s18 }
  0x67   : > { %p680_p0 = por %p679_p6, %p678_p13 }
  0x69   : > { %p682_p2 = por %p681_p1, %p680_p0 }
  0x6b   : > { %p683_p3 = pnand %p682_p2, %p676_p12 }
  0x6d   : > { %686 = shalt.err (!%p683_p3)  }
  0x6e   : > { %s687_s14 = scalar_lea.vmem %s130_s25, 16  ;;  %p692_p5 = scmp.lt.s32.totalorder %s130_s25, %s1165_s11 }
  0x6f   : > { %p688_p4 = scmp.ne.s32.totalorder %s130_s25, %s687_s14  ;;  %p693_p7 = scmp.lt.s32.totalorder %s1168_s0, %s687_s14 }
  0x71   : > { %p694_p8 = por %p693_p7, %p692_p5 }
  0x73   : > { %p695_p11 = pnand %p694_p8, %p688_p4 }
  0x75   : > { %698 = shalt.err (!%p695_p11)  }
  0x76   : > { %132 = dma.hbm_to_vmem [thread:$0]  %s120_s18, 16, %s130_s25, [#allocation2] }
  0x77   : > { %s138_s8 = scalar_lea.vmem %s1134_s6, 4 [#allocation5]  ;;  %s1215_s4 = sld [smem:[#allocation4 + $0x5]] }
  0x78   : > { %s146_s5 = sshll.u32 %s138_s8, 4  ;;  %s155_s27 = scalar_lea.vmem %s1134_s6, 5 [#allocation5]  ;;  %s147_s5 = int_to_ptr.vmem [resolvable:$true] %s146_s5 }
  0x79   : > { %s163_s13 = sshll.u32 %s155_s27, 4  ;;  %s1220_s9 = sld [smem:[#allocation4 + $0x6]]  ;;  %s1218_s13 = int_to_ptr.vmem [resolvable:$true] %s163_s13 }
  0x7a   : > { %s135_s12 = sadd.s32 %s520_s23, %s1130_s30  ;;  %s172_s15 = scalar_lea.vmem %s1134_s6, 6 [#allocation5] }
  0x7b   : > { %s521_s16 = sshll.u32 %s135_s12, 4  ;;  %s180_s17 = sshll.u32 %s172_s15, 4  ;;  %s1235_s17 = int_to_ptr.vmem [resolvable:$true] %s180_s17 }
  0x7c   : > { %s137_s10 = scalar_lea.hbm %s1460_s1, %s521_s16 }
  0x7d   : > { %s152_s24 = sadd.s32 %s1215_s4, %s1130_s30  ;;  %s699_s3 = scalar_lea.hbm %s137_s10, 16 }
  0x7e   : > { %p700_p12 = scmp.ne.s32.totalorder %s137_s10, %s699_s3  ;;  %p702_p13 = scmp.lt.u32.totalorder %s137_s10, %s1460_s1 }
  0x7f   : > { %p703_p6 = scmp.lt.u32.totalorder %s1157_s29, %s699_s3  ;;  %p705_p1 = scmp.lt.u32.totalorder %s699_s3, %s137_s10 }
  0x81   : > { %p704_p0 = por %p703_p6, %p702_p13 }
  0x83   : > { %p706_p2 = por %p705_p1, %p704_p0 }
  0x85   : > { %p707_p3 = pnand %p706_p2, %p700_p12 }
  0x87   : > { %710 = shalt.err (!%p707_p3)  }
  0x88   : > { %s711_s23 = scalar_lea.vmem %s147_s5, 16  ;;  %p716_p5 = scmp.lt.s32.totalorder %s147_s5, %s1165_s11 }
  0x89   : > { %p712_p4 = scmp.ne.s32.totalorder %s147_s5, %s711_s23  ;;  %p717_p7 = scmp.lt.s32.totalorder %s1168_s0, %s711_s23 }
  0x8b   : > { %p718_p8 = por %p717_p7, %p716_p5 }
  0x8d   : > { %p719_p11 = pnand %p718_p8, %p712_p4 }
  0x8f   : > { %722 = shalt.err (!%p719_p11)  }
  0x90   : > { %149 = dma.hbm_to_vmem [thread:$0]  %s137_s10, 16, %s147_s5, [#allocation2] }
  0x91   : > { %s523_s4 = sshll.u32 %s152_s24, 4  ;;  %s169_s16 = sadd.s32 %s1220_s9, %s1130_s30 }
  0x92   : > { %s154_s15 = scalar_lea.hbm %s1460_s1, %s523_s4 }
  0x93   : > { %s723_s18 = scalar_lea.hbm %s154_s15, 16  ;;  %p726_p13 = scmp.lt.u32.totalorder %s154_s15, %s1460_s1 }
  0x94   : > { %p724_p12 = scmp.ne.s32.totalorder %s154_s15, %s723_s18  ;;  %p727_p6 = scmp.lt.u32.totalorder %s1157_s29, %s723_s18 }
  0x95   : > { %p729_p1 = scmp.lt.u32.totalorder %s723_s18, %s154_s15 }
  0x96   : > { %p728_p0 = por %p727_p6, %p726_p13 }
  0x98   : > { %p730_p2 = por %p729_p1, %p728_p0 }
  0x9a   : > { %p731_p3 = pnand %p730_p2, %p724_p12 }
  0x9c   : > { %734 = shalt.err (!%p731_p3)  }
  0x9d   : > { %s735_s5 = scalar_lea.vmem %s1218_s13, 16  ;;  %p740_p5 = scmp.lt.s32.totalorder %s1218_s13, %s1165_s11 }
  0x9e   : > { %p736_p4 = scmp.ne.s32.totalorder %s1218_s13, %s735_s5  ;;  %p741_p7 = scmp.lt.s32.totalorder %s1168_s0, %s735_s5 }
  0xa0   : > { %p742_p8 = por %p741_p7, %p740_p5 }
  0xa2   : > { %p743_p11 = pnand %p742_p8, %p736_p4 }
  0xa4   : > { %746 = shalt.err (!%p743_p11)  }
  0xa5   : > { %166 = dma.hbm_to_vmem [thread:$0]  %s154_s15, 16, %s1218_s13, [#allocation2] }
  0xa6   : > { %s525_s9 = sshll.u32 %s169_s16, 4  ;;  %s526_s10 = sld [smem:[#allocation4 + $0x7]] }
  0xa7   : > { %s171_s8 = scalar_lea.hbm %s1460_s1, %s525_s9  ;;  %s189_s23 = scalar_lea.vmem %s1134_s6, 7 [#allocation5] }
  0xa8   : > { %s747_s4 = scalar_lea.hbm %s171_s8, 16  ;;  %p750_p13 = scmp.lt.u32.totalorder %s171_s8, %s1460_s1 }
  0xa9   : > { %p748_p12 = scmp.ne.s32.totalorder %s171_s8, %s747_s4  ;;  %p751_p6 = scmp.lt.u32.totalorder %s1157_s29, %s747_s4 }
  0xaa   : > { %p753_p1 = scmp.lt.u32.totalorder %s747_s4, %s171_s8 }
  0xab   : > { %p752_p0 = por %p751_p6, %p750_p13 }
  0xad   : > { %p754_p2 = por %p753_p1, %p752_p0 }
  0xaf   : > { %p755_p3 = pnand %p754_p2, %p748_p12 }
  0xb1   : > { %758 = shalt.err (!%p755_p3)  }
  0xb2   : > { %s759_s13 = scalar_lea.vmem %s1235_s17, 16  ;;  %p764_p5 = scmp.lt.s32.totalorder %s1235_s17, %s1165_s11 }
  0xb3   : > { %p760_p4 = scmp.ne.s32.totalorder %s1235_s17, %s759_s13  ;;  %p765_p7 = scmp.lt.s32.totalorder %s1168_s0, %s759_s13 }
  0xb5   : > { %p766_p8 = por %p765_p7, %p764_p5 }
  0xb7   : > { %p767_p11 = pnand %p766_p8, %p760_p4 }
  0xb9   : > { %770 = shalt.err (!%p767_p11)  }
  0xba   : > { %183 = dma.hbm_to_vmem [thread:$0]  %s171_s8, 16, %s1235_s17, [#allocation2] }
  0xbb   : > { %s197_s15 = sshll.u32 %s189_s23, 4  ;;  %s1266_s16 = sld [smem:[#allocation4 + $0x8]]  ;;  %s198_s15 = int_to_ptr.vmem [resolvable:$true] %s197_s15 }
  0xbc   : > { %s206_s18 = scalar_lea.vmem %s1134_s6, 8 [#allocation5]  ;;  %s1269_s3 = sld [smem:[#allocation4 + $0x9]] }
  0xbd   : > { %s214_s25 = sshll.u32 %s206_s18, 4  ;;  %s186_s5 = sadd.s32 %s526_s10, %s1130_s30  ;;  %s1272_s25 = int_to_ptr.vmem [resolvable:$true] %s214_s25 }
  0xbe   : > { %s527_s9 = sshll.u32 %s186_s5, 4  ;;  %s223_s24 = scalar_lea.vmem %s1134_s6, 9 [#allocation5] }
  0xbf   : > { %s188_s27 = scalar_lea.hbm %s1460_s1, %s527_s9  ;;  %s231_s12 = sshll.u32 %s223_s24, 4  ;;  %s1286_s12 = int_to_ptr.vmem [resolvable:$true] %s231_s12 }
  0xc0   : > { %s771_s17 = scalar_lea.hbm %s188_s27, 16  ;;  %p774_p13 = scmp.lt.u32.totalorder %s188_s27, %s1460_s1 }
  0xc1   : > { %p772_p12 = scmp.ne.s32.totalorder %s188_s27, %s771_s17  ;;  %p775_p6 = scmp.lt.u32.totalorder %s1157_s29, %s771_s17 }
  0xc2   : > { %p777_p1 = scmp.lt.u32.totalorder %s771_s17, %s188_s27 }
  0xc3   : > { %p776_p0 = por %p775_p6, %p774_p13 }
  0xc5   : > { %p778_p2 = por %p777_p1, %p776_p0 }
  0xc7   : > { %p779_p3 = pnand %p778_p2, %p772_p12 }
  0xc9   : > { %782 = shalt.err (!%p779_p3)  }
  0xca   : > { %s783_s10 = scalar_lea.vmem %s198_s15, 16  ;;  %p788_p5 = scmp.lt.s32.totalorder %s198_s15, %s1165_s11 }
  0xcb   : > { %p784_p4 = scmp.ne.s32.totalorder %s198_s15, %s783_s10  ;;  %p789_p7 = scmp.lt.s32.totalorder %s1168_s0, %s783_s10 }
  0xcd   : > { %p790_p8 = por %p789_p7, %p788_p5 }
  0xcf   : > { %p791_p11 = pnand %p790_p8, %p784_p4 }
  0xd1   : > { %794 = shalt.err (!%p791_p11)  }
  0xd2   : > { %200 = dma.hbm_to_vmem [thread:$0]  %s188_s27, 16, %s198_s15, [#allocation2] }
  0xd3   : > { %s203_s13 = sadd.s32 %s1266_s16, %s1130_s30  ;;  %s220_s5 = sadd.s32 %s1269_s3, %s1130_s30 }
  0xd4   : > { %s529_s18 = sshll.u32 %s203_s13, 4  ;;  %s531_s4 = sshll.u32 %s220_s5, 4 }
  0xd5   : > { %s205_s14 = scalar_lea.hbm %s1460_s1, %s529_s18 }
  0xd6   : > { %s795_s17 = scalar_lea.hbm %s205_s14, 16  ;;  %p798_p13 = scmp.lt.u32.totalorder %s205_s14, %s1460_s1 }
  0xd7   : > { %p796_p12 = scmp.ne.s32.totalorder %s205_s14, %s795_s17  ;;  %p799_p6 = scmp.lt.u32.totalorder %s1157_s29, %s795_s17 }
  0xd8   : > { %p801_p1 = scmp.lt.u32.totalorder %s795_s17, %s205_s14 }
  0xd9   : > { %p800_p0 = por %p799_p6, %p798_p13 }
  0xdb   : > { %p802_p2 = por %p801_p1, %p800_p0 }
  0xdd   : > { %p803_p3 = pnand %p802_p2, %p796_p12 }
  0xdf   : > { %806 = shalt.err (!%p803_p3)  }
  0xe0   : > { %s807_s15 = scalar_lea.vmem %s1272_s25, 16  ;;  %p812_p5 = scmp.lt.s32.totalorder %s1272_s25, %s1165_s11 }
  0xe1   : > { %p808_p4 = scmp.ne.s32.totalorder %s1272_s25, %s807_s15  ;;  %p813_p7 = scmp.lt.s32.totalorder %s1168_s0, %s807_s15 }
  0xe3   : > { %p814_p8 = por %p813_p7, %p812_p5 }
  0xe5   : > { %p815_p11 = pnand %p814_p8, %p808_p4 }
  0xe7   : > { %818 = shalt.err (!%p815_p11)  }
  0xe8   : > { %217 = dma.hbm_to_vmem [thread:$0]  %s205_s14, 16, %s1272_s25, [#allocation2] }
  0xe9   : > { %s222_s27 = scalar_lea.hbm %s1460_s1, %s531_s4  ;;  %s532_s10 = sld [smem:[#allocation4 + $0xa]] }
  0xea   : > { %s819_s13 = scalar_lea.hbm %s222_s27, 16  ;;  %p822_p13 = scmp.lt.u32.totalorder %s222_s27, %s1460_s1 }
  0xeb   : > { %p820_p12 = scmp.ne.s32.totalorder %s222_s27, %s819_s13  ;;  %p823_p6 = scmp.lt.u32.totalorder %s1157_s29, %s819_s13 }
  0xec   : > { %p825_p1 = scmp.lt.u32.totalorder %s819_s13, %s222_s27 }
  0xed   : > { %p824_p0 = por %p823_p6, %p822_p13 }
  0xef   : > { %p826_p2 = por %p825_p1, %p824_p0 }
  0xf1   : > { %p827_p3 = pnand %p826_p2, %p820_p12 }
  0xf3   : > { %830 = shalt.err (!%p827_p3)  }
  0xf4   : > { %s831_s25 = scalar_lea.vmem %s1286_s12, 16  ;;  %p836_p5 = scmp.lt.s32.totalorder %s1286_s12, %s1165_s11 }
  0xf5   : > { %p832_p4 = scmp.ne.s32.totalorder %s1286_s12, %s831_s25  ;;  %p837_p7 = scmp.lt.s32.totalorder %s1168_s0, %s831_s25 }
  0xf7   : > { %p838_p8 = por %p837_p7, %p836_p5 }
  0xf9   : > { %p839_p11 = pnand %p838_p8, %p832_p4 }
  0xfb   : > { %842 = shalt.err (!%p839_p11)  }
  0xfc   : > { %234 = dma.hbm_to_vmem [thread:$0]  %s222_s27, 16, %s1286_s12, [#allocation2] }
  0xfd   : > { %s240_s9 = scalar_lea.vmem %s1134_s6, 10 [#allocation5]  ;;  %s1317_s24 = sld [smem:[#allocation4 + $0xb]] }
  0xfe   : > { %s248_s14 = sshll.u32 %s240_s9, 4  ;;  %s257_s4 = scalar_lea.vmem %s1134_s6, 11 [#allocation5]  ;;  %s249_s14 = int_to_ptr.vmem [resolvable:$true] %s248_s14 }
  0xff   : > { %s265_s17 = sshll.u32 %s257_s4, 4  ;;  %s1322_s8 = sld [smem:[#allocation4 + $0xc]]  ;;  %s1320_s17 = int_to_ptr.vmem [resolvable:$true] %s265_s17 }
 0x100   : > { %s237_s23 = sadd.s32 %s532_s10, %s1130_s30  ;;  %s274_s15 = scalar_lea.vmem %s1134_s6, 12 [#allocation5] }
 0x101   : > { %s533_s16 = sshll.u32 %s237_s23, 4  ;;  %s282_s3 = sshll.u32 %s274_s15, 4  ;;  %s1337_s3 = int_to_ptr.vmem [resolvable:$true] %s282_s3 }
 0x102   : > { %s239_s12 = scalar_lea.hbm %s1460_s1, %s533_s16 }
 0x103   : > { %s254_s27 = sadd.s32 %s1317_s24, %s1130_s30  ;;  %s843_s5 = scalar_lea.hbm %s239_s12, 16 }
 0x104   : > { %p844_p12 = scmp.ne.s32.totalorder %s239_s12, %s843_s5  ;;  %p846_p13 = scmp.lt.u32.totalorder %s239_s12, %s1460_s1 }
 0x105   : > { %p847_p6 = scmp.lt.u32.totalorder %s1157_s29, %s843_s5  ;;  %p849_p1 = scmp.lt.u32.totalorder %s843_s5, %s239_s12 }
 0x107   : > { %p848_p0 = por %p847_p6, %p846_p13 }
 0x109   : > { %p850_p2 = por %p849_p1, %p848_p0 }
 0x10b   : > { %p851_p3 = pnand %p850_p2, %p844_p12 }
 0x10d   : > { %854 = shalt.err (!%p851_p3)  }
 0x10e   : > { %s855_s10 = scalar_lea.vmem %s249_s14, 16  ;;  %p860_p5 = scmp.lt.s32.totalorder %s249_s14, %s1165_s11 }
 0x10f   : > { %p856_p4 = scmp.ne.s32.totalorder %s249_s14, %s855_s10  ;;  %p861_p7 = scmp.lt.s32.totalorder %s1168_s0, %s855_s10 }
 0x111   : > { %p862_p8 = por %p861_p7, %p860_p5 }
 0x113   : > { %p863_p11 = pnand %p862_p8, %p856_p4 }
 0x115   : > { %866 = shalt.err (!%p863_p11)  }
 0x116   : > { %251 = dma.hbm_to_vmem [thread:$0]  %s239_s12, 16, %s249_s14, [#allocation2] }
 0x117   : > { %s535_s24 = sshll.u32 %s254_s27, 4  ;;  %s271_s16 = sadd.s32 %s1322_s8, %s1130_s30 }
 0x118   : > { %s256_s15 = scalar_lea.hbm %s1460_s1, %s535_s24 }
 0x119   : > { %s867_s13 = scalar_lea.hbm %s256_s15, 16  ;;  %p870_p13 = scmp.lt.u32.totalorder %s256_s15, %s1460_s1 }
 0x11a   : > { %p868_p12 = scmp.ne.s32.totalorder %s256_s15, %s867_s13  ;;  %p871_p6 = scmp.lt.u32.totalorder %s1157_s29, %s867_s13 }
 0x11b   : > { %p873_p1 = scmp.lt.u32.totalorder %s867_s13, %s256_s15 }
 0x11c   : > { %p872_p0 = por %p871_p6, %p870_p13 }
 0x11e   : > { %p874_p2 = por %p873_p1, %p872_p0 }
 0x120   : > { %p875_p3 = pnand %p874_p2, %p868_p12 }
 0x122   : > { %878 = shalt.err (!%p875_p3)  }
 0x123   : > { %s879_s14 = scalar_lea.vmem %s1320_s17, 16  ;;  %p884_p5 = scmp.lt.s32.totalorder %s1320_s17, %s1165_s11 }
 0x124   : > { %p880_p4 = scmp.ne.s32.totalorder %s1320_s17, %s879_s14  ;;  %p885_p7 = scmp.lt.s32.totalorder %s1168_s0, %s879_s14 }
 0x126   : > { %p886_p8 = por %p885_p7, %p884_p5 }
 0x128   : > { %p887_p11 = pnand %p886_p8, %p880_p4 }
 0x12a   : > { %890 = shalt.err (!%p887_p11)  }
 0x12b   : > { %268 = dma.hbm_to_vmem [thread:$0]  %s256_s15, 16, %s1320_s17, [#allocation2] }
 0x12c   : > { %s537_s8 = sshll.u32 %s271_s16, 4  ;;  %s538_s12 = sld [smem:[#allocation4 + $0xd]] }
 0x12d   : > { %s273_s9 = scalar_lea.hbm %s1460_s1, %s537_s8  ;;  %s291_s10 = scalar_lea.vmem %s1134_s6, 13 [#allocation5] }
 0x12e   : > { %s891_s24 = scalar_lea.hbm %s273_s9, 16  ;;  %p894_p13 = scmp.lt.u32.totalorder %s273_s9, %s1460_s1 }
 0x12f   : > { %p892_p12 = scmp.ne.s32.totalorder %s273_s9, %s891_s24  ;;  %p895_p6 = scmp.lt.u32.totalorder %s1157_s29, %s891_s24 }
 0x130   : > { %p897_p1 = scmp.lt.u32.totalorder %s891_s24, %s273_s9 }
 0x131   : > { %p896_p0 = por %p895_p6, %p894_p13 }
 0x133   : > { %p898_p2 = por %p897_p1, %p896_p0 }
 0x135   : > { %p899_p3 = pnand %p898_p2, %p892_p12 }
 0x137   : > { %902 = shalt.err (!%p899_p3)  }
 0x138   : > { %s903_s17 = scalar_lea.vmem %s1337_s3, 16  ;;  %p908_p5 = scmp.lt.s32.totalorder %s1337_s3, %s1165_s11 }
 0x139   : > { %p904_p4 = scmp.ne.s32.totalorder %s1337_s3, %s903_s17  ;;  %p909_p7 = scmp.lt.s32.totalorder %s1168_s0, %s903_s17 }
 0x13b   : > { %p910_p8 = por %p909_p7, %p908_p5 }
 0x13d   : > { %p911_p11 = pnand %p910_p8, %p904_p4 }
 0x13f   : > { %914 = shalt.err (!%p911_p11)  }
 0x140   : > { %285 = dma.hbm_to_vmem [thread:$0]  %s273_s9, 16, %s1337_s3, [#allocation2] }
 0x141   : > { %s299_s15 = sshll.u32 %s291_s10, 4  ;;  %s1368_s16 = sld [smem:[#allocation4 + $0xe]]  ;;  %s300_s15 = int_to_ptr.vmem [resolvable:$true] %s299_s15 }
 0x142   : > { %s308_s13 = scalar_lea.vmem %s1134_s6, 14 [#allocation5]  ;;  %s1371_s5 = sld [smem:[#allocation4 + $0xf]] }
 0x143   : > { %s316_s18 = sshll.u32 %s308_s13, 4  ;;  %s288_s14 = sadd.s32 %s538_s12, %s1130_s30  ;;  %s1374_s18 = int_to_ptr.vmem [resolvable:$true] %s316_s18 }
 0x144   : > { %s539_s8 = sshll.u32 %s288_s14, 4  ;;  %s325_s27 = scalar_lea.vmem %s1134_s6, 15 [#allocation5] }
 0x145   : > { %s290_s4 = scalar_lea.hbm %s1460_s1, %s539_s8  ;;  %s333_s23 = sshll.u32 %s325_s27, 4  ;;  %s1388_s23 = int_to_ptr.vmem [resolvable:$true] %s333_s23 }
 0x146   : > { %s915_s3 = scalar_lea.hbm %s290_s4, 16  ;;  %p918_p13 = scmp.lt.u32.totalorder %s290_s4, %s1460_s1 }
 0x147   : > { %p916_p12 = scmp.ne.s32.totalorder %s290_s4, %s915_s3  ;;  %p919_p6 = scmp.lt.u32.totalorder %s1157_s29, %s915_s3 }
 0x148   : > { %p921_p1 = scmp.lt.u32.totalorder %s915_s3, %s290_s4 }
 0x149   : > { %p920_p0 = por %p919_p6, %p918_p13 }
 0x14b   : > { %p922_p2 = por %p921_p1, %p920_p0 }
 0x14d   : > { %p923_p3 = pnand %p922_p2, %p916_p12 }
 0x14f   : > { %926 = shalt.err (!%p923_p3)  }
 0x150   : > { %s927_s12 = scalar_lea.vmem %s300_s15, 16  ;;  %p932_p5 = scmp.lt.s32.totalorder %s300_s15, %s1165_s11 }
 0x151   : > { %p928_p4 = scmp.ne.s32.totalorder %s300_s15, %s927_s12  ;;  %p933_p7 = scmp.lt.s32.totalorder %s1168_s0, %s927_s12 }
 0x153   : > { %p934_p8 = por %p933_p7, %p932_p5 }
 0x155   : > { %p935_p11 = pnand %p934_p8, %p928_p4 }
 0x157   : > { %938 = shalt.err (!%p935_p11)  }
 0x158   : > { %302 = dma.hbm_to_vmem [thread:$0]  %s290_s4, 16, %s300_s15, [#allocation2] }
 0x159   : > { %s305_s6 = sadd.s32 %s1368_s16, %s1130_s30  ;;  %s322_s13 = sadd.s32 %s1371_s5, %s1130_s30 }
 0x15a   : > { %s541_s17 = sshll.u32 %s305_s6, 4  ;;  %s543_s25 = sshll.u32 %s322_s13, 4 }
 0x15b   : > { %s307_s27 = scalar_lea.hbm %s1460_s1, %s541_s17 }
 0x15c   : > { %s939_s24 = scalar_lea.hbm %s307_s27, 16  ;;  %p942_p13 = scmp.lt.u32.totalorder %s307_s27, %s1460_s1 }
 0x15d   : > { %p940_p12 = scmp.ne.s32.totalorder %s307_s27, %s939_s24  ;;  %p943_p6 = scmp.lt.u32.totalorder %s1157_s29, %s939_s24 }
 0x15e   : > { %p945_p1 = scmp.lt.u32.totalorder %s939_s24, %s307_s27 }
 0x15f   : > { %p944_p0 = por %p943_p6, %p942_p13 }
 0x161   : > { %p946_p2 = por %p945_p1, %p944_p0 }
 0x163   : > { %p947_p3 = pnand %p946_p2, %p940_p12 }
 0x165   : > { %950 = shalt.err (!%p947_p3)  }
 0x166   : > { %s951_s30 = scalar_lea.vmem %s1374_s18, 16  ;;  %p956_p5 = scmp.lt.s32.totalorder %s1374_s18, %s1165_s11 }
 0x167   : > { %p952_p4 = scmp.ne.s32.totalorder %s1374_s18, %s951_s30  ;;  %p957_p7 = scmp.lt.s32.totalorder %s1168_s0, %s951_s30 }
 0x169   : > { %p958_p8 = por %p957_p7, %p956_p5 }
 0x16b   : > { %p959_p11 = pnand %p958_p8, %p952_p4 }
 0x16d   : > { %962 = shalt.err (!%p959_p11)  }
 0x16e   : > { %319 = dma.hbm_to_vmem [thread:$0]  %s307_s27, 16, %s1374_s18, [#allocation2] }
 0x16f   : > { %s324_s5 = scalar_lea.hbm %s1460_s1, %s543_s25 }
 0x170   : > { %s963_s4 = scalar_lea.hbm %s324_s5, 16  ;;  %p966_p13 = scmp.lt.u32.totalorder %s324_s5, %s1460_s1 }
 0x171   : > { %p964_p12 = scmp.ne.s32.totalorder %s324_s5, %s963_s4  ;;  %p967_p6 = scmp.lt.u32.totalorder %s1157_s29, %s963_s4 }
 0x172   : > { %p969_p1 = scmp.lt.u32.totalorder %s963_s4, %s324_s5 }
 0x173   : > { %p968_p0 = por %p967_p6, %p966_p13 }
 0x175   : > { %p970_p2 = por %p969_p1, %p968_p0 }
 0x177   : > { %p971_p3 = pnand %p970_p2, %p964_p12 }
 0x179   : > { %974 = shalt.err (!%p971_p3)  }
 0x17a   : > { %s975_s18 = scalar_lea.vmem %s1388_s23, 16  ;;  %p980_p5 = scmp.lt.s32.totalorder %s1388_s23, %s1165_s11 }
 0x17b   : > { %p976_p4 = scmp.ne.s32.totalorder %s1388_s23, %s975_s18  ;;  %p981_p7 = scmp.lt.s32.totalorder %s1168_s0, %s975_s18 }
 0x17d   : > { %p982_p8 = por %p981_p7, %p980_p5 }
 0x17f   : > { %p983_p11 = pnand %p982_p8, %p976_p4 }
 0x181   : > { %986 = shalt.err (!%p983_p11)  }
 0x182   : > { %336 = dma.hbm_to_vmem [thread:$0]  %s324_s5, 16, %s1388_s23, [#allocation2] }
 0x183   : > { %1033 = dma.done.wait [#allocation2], 256 }
 0x184   : > { %1034 = vsyncadd [#allocation2], 4294967040  ;;  %s550_s29 = sshll.u32 %s1049_s21, 8  ;;  %s1469_s14 = sand.u32 1, %s1045_s20  }
 0x185   : > { %s385_s13 = scalar_lea.hbm %s1461_s2, %s550_s29  ;;  %s371_s8 = scalar_lea.sflag [#allocation6], %s1469_s14 }
 0x186   : > { %s987_s27 = scalar_lea.vmem %s1138_s7, 256  ;;  %p1470_p1 = scmp.lt.s32.totalorder %s1138_s7, %s1165_s11 }
 0x187   : > { %p988_p12 = scmp.ne.s32.totalorder %s1138_s7, %s987_s27  ;;  %p995_p0 = scmp.lt.s32.totalorder %s1168_s0, %s987_s27 }
 0x189   : > { %p989_p13 = pnand %p988_p12, %p1123_p10  ;;  %p996_p2 = por %p995_p0, %p1470_p1 }
 0x18b   : > { %p990_p6 = pneg %p989_p13 }
 0x18d   : > { %p997_p3 = pnand %p996_p2, %p990_p6 }
 0x18f   : > { %1000 = shalt.err (!%p997_p3)
}
 0x190   : > { %s1001_s23 = scalar_lea.hbm %s385_s13, 256  ;;  %s1005_s24 = scalar_lea.hbm %s1461_s2, 768 }
 0x191   : > { %p1002_p4 = scmp.ne.s32.totalorder %s385_s13, %s1001_s23  ;;  %p1006_p8 = scmp.lt.u32.totalorder %s385_s13, %s1461_s2 }
 0x192   : > { %p1007_p11 = scmp.lt.u32.totalorder %s1005_s24, %s1001_s23  ;;  %p1009_p13 = scmp.lt.u32.totalorder %s1001_s23, %s385_s13 }
 0x193   : > { %p1003_p5 = pnand %p1002_p4, %p1123_p10 }
 0x194   : > { %p1008_p12 = por %p1007_p11, %p1006_p8 }
 0x195   : > { %p1004_p7 = pneg %p1003_p5 }
 0x196   : > { %p1010_p0 = por %p1009_p13, %p1008_p12 }
 0x198   : > { %p1011_p6 = pnand %p1010_p0, %p1004_p7 }
 0x19a   : > { %1014 = shalt.err (!%p1011_p6)
}
 0x19b   : > { %s1057_s11 = smov 128   ;;  %s1058_s0 = smov 8  }
 0x19c   : > { %551 = dma.vmem_to_hbm [thread:$0]  (%p1123_p10), %s1138_s7, 256, %s385_s13, %s371_s8, %s1057_s11, %s1057_s11, %s1058_s0  }
 0x19d PF: > { %p557_p1 = scmp.ge.s32.totalorder %s1053_s22, 1  ;;  %s401_s30 = sand.u32 1, %s1041_s19  }
 0x19e   : > { %s402_s15 = scalar_lea.sflag [#allocation6], %s401_s30 }
 0x19f   : > { %p554_p2 = pnand %p557_p1, %p1116_p9 }
 0x1a1   : > { %1036 = dma.done.wait (!%p554_p2), %s402_s15, 256  }
 0x1a2   : > { %1038 = vsyncadd (!%p554_p2), %s402_s15, 4294967040  ;;  %s19_s22 = sadd.s32 1, %s1053_s22   ;;  %s1471_s16 = sld [smem:[#allocation45_spill]] }
 0x1a3   : > { %p16_p3 = scmp.ge.s32.totalorder %s19_s22, 4   ;;  %s1472_s21 = sld [smem:[#allocation44_spill]] }
 0x1a4   : > { %s1473_s19 = smov %s1045_s20 }
 0x1a5   :  { %18 = sbr.rel (!%p16_p3) target bundleno = 15 (0xf), region = 139 }
 0x1a8   : > { %s1474_s20 = smov %s1471_s16 }
 0x1ac   :  { %407 = vsyncpa [#allocation6], 1 }
 0x1ad   :  { %409 = vsyncpa [#allocation6 + $0x1], 1 }
 0x1ae   :  { %410 = vsyncmov [#allocation2] }
 0x1b1   :  { %s411_s26 = vpop.sfrf %410 }
 0x1b2   :  { %p549_p9 = scmp.ne.s32.totalorder %s411_s26, 0 }
 0x1b4   :  { %415 = shalt.err (%p549_p9)  }

</bundles_post_ra>
